<compile_context>
chip_gen: v7x
topology: tpu7x:2x2x1
jax: 0.10.0
libtpu: 0.0.40
codegen_flags: <defaults>
</compile_context>

<pallas_src>
import functools

import jax
import jax.numpy as jnp
from jax import lax
from jax.experimental import pallas as pl
from jax.experimental.pallas import tpu as pltpu


_VMEM_LIMIT = 48 * 1024 * 1024  # above 16/32 MiB scoped defaults, below v7x physical 64 MiB


def _round_up(x, m):
    return (x + m - 1) // m * m


def _pick_block_m(m, cap=256):
    bm = min(cap, _round_up(m, 8))
    return bm, _round_up(m, bm)


# ----------------------------- Pallas kernels -----------------------------

def _embed_kernel(p4_ref, p8_ref, w4_ref, b4_ref, w8_ref, b8_ref, o_ref):
    e4 = jnp.dot(p4_ref[...], w4_ref[...],
                 preferred_element_type=jnp.float32) + b4_ref[...]
    e8 = jnp.dot(p8_ref[...], w8_ref[...],
                 preferred_element_type=jnp.float32) + b8_ref[...]
    o_ref[...] = jnp.concatenate([e4, e8], axis=-1).astype(o_ref.dtype)


def _attn_block_kernel(x_ref, g_ref, b_ref, wqkv_ref, bqkv_ref, wo_ref, bo_ref,
                       o_ref, *, heads, eps, scale):
    x = x_ref[0].astype(jnp.float32)                       # (T, D)
    T, D = x.shape
    dh = D // heads

    # LayerNorm (f32 math — keeps v5e VPU/EUP on the f32 path).
    mean = jnp.mean(x, axis=-1, keepdims=True)
    var = jnp.mean(jnp.square(x - mean), axis=-1, keepdims=True)
    x_ln = (x - mean) * lax.rsqrt(var + eps) * g_ref[...] + b_ref[...]

    # Fused QKV projection (bf16 operands, f32 accumulation on the MXU).
    qkv = jnp.dot(x_ln.astype(jnp.bfloat16), wqkv_ref[...],
                  preferred_element_type=jnp.float32) + bqkv_ref[...]   # (T, 3D)

    # Per-head attention, heads kept in-register (HBM blocks stay lane-dense in D).
    outs = []
    for h in range(heads):
        qh = qkv[:, h * dh:(h + 1) * dh]
        kh = qkv[:, D + h * dh:D + (h + 1) * dh]
        vh = qkv[:, 2 * D + h * dh:2 * D + (h + 1) * dh]
        s = jnp.dot(qh.astype(jnp.bfloat16), kh.astype(jnp.bfloat16).T,
                    preferred_element_type=jnp.float32) * scale         # (T, T)
        s = s - jnp.max(s, axis=-1, keepdims=True)
        p = jnp.exp(s)
        p = p * pl.reciprocal(jnp.sum(p, axis=-1, keepdims=True), approx=True)
        outs.append(jnp.dot(p.astype(jnp.bfloat16), vh.astype(jnp.bfloat16),
                            preferred_element_type=jnp.float32))        # (T, dh)
    attn = jnp.concatenate(outs, axis=-1)                               # (T, D)

    proj = jnp.dot(attn.astype(jnp.bfloat16), wo_ref[...],
                   preferred_element_type=jnp.float32) + bo_ref[...]
    o_ref[0] = (x + proj).astype(o_ref.dtype)


def _mlp_seg_kernel(x_ref, g_ref, b_ref, w1_ref, b1_ref, w2_ref, b2_ref,
                    wseg_ref, bseg_ref, o_ref, *, eps):
    x = x_ref[...].astype(jnp.float32)                     # (bm, D)
    mean = jnp.mean(x, axis=-1, keepdims=True)
    var = jnp.mean(jnp.square(x - mean), axis=-1, keepdims=True)
    x_ln = (x - mean) * lax.rsqrt(var + eps) * g_ref[...] + b_ref[...]

    h1 = jnp.dot(x_ln.astype(jnp.bfloat16), w1_ref[...],
                 preferred_element_type=jnp.float32) + b1_ref[...]
    # TODO(synk): PyTorch nn.GELU() default is the exact erf form; tanh-approx
    #             used here for a guaranteed Mosaic transcendental lowering.
    h1 = jax.nn.gelu(h1, approximate=True)
    h2 = jnp.dot(h1.astype(jnp.bfloat16), w2_ref[...],
                 preferred_element_type=jnp.float32) + b2_ref[...]
    y = x + h2                                             # residual tokens

    # Segmentation head (1x1 conv == per-token linear), class axis padded to
    # 128 lanes so the output store is unmasked.
    logits = jnp.dot(y.astype(jnp.bfloat16), wseg_ref[...],
                     preferred_element_type=jnp.float32) + bseg_ref[...]
    o_ref[...] = logits


# ----------------------------- kernel wrappers -----------------------------

def _embed(p4, p8, params, bm):
    Mp, K4 = p4.shape
    K8 = p8.shape[1]
    half = params["w_embed4"].shape[1]
    D = 2 * half
    w4 = params["w_embed4"].astype(jnp.bfloat16)
    w8 = params["w_embed8"].astype(jnp.bfloat16)
    b4 = params["b_embed4"].reshape(1, half).astype(jnp.float32)
    b8 = params["b_embed8"].reshape(1, half).astype(jnp.float32)
    return pl.pallas_call(
        _embed_kernel,
        out_shape=jax.ShapeDtypeStruct((Mp, D), jnp.bfloat16),
        grid=(Mp // bm,),
        in_specs=[
            pl.BlockSpec((bm, K4), lambda i: (i, 0)),
            pl.BlockSpec((bm, K8), lambda i: (i, 0)),
            pl.BlockSpec((K4, half), lambda i: (0, 0)),
            pl.BlockSpec((1, half), lambda i: (0, 0)),
            pl.BlockSpec((K8, half), lambda i: (0, 0)),
            pl.BlockSpec((1, half), lambda i: (0, 0)),
        ],
        out_specs=pl.BlockSpec((bm, D), lambda i: (i, 0)),
        compiler_params=pltpu.CompilerParams(
            dimension_semantics=("parallel",),
            vmem_limit_bytes=_VMEM_LIMIT),
    )(p4, p8, w4, b4, w8, b8)


def _attn_block(tokens, params, heads, eps=1e-5):
    B, T, D = tokens.shape
    dh = D // heads
    scale = float(dh) ** -0.5
    g = params["ln1_g"].reshape(1, D).astype(jnp.float32)
    b = params["ln1_b"].reshape(1, D).astype(jnp.float32)
    wqkv = params["w_qkv"].astype(jnp.bfloat16)
    bqkv = params["b_qkv"].reshape(1, 3 * D).astype(jnp.float32)
    wo = params["w_attn_out"].astype(jnp.bfloat16)
    bo = params["b_attn_out"].reshape(1, D).astype(jnp.float32)
    return pl.pallas_call(
        functools.partial(_attn_block_kernel, heads=heads, eps=eps, scale=scale),
        out_shape=jax.ShapeDtypeStruct((B, T, D), jnp.bfloat16),
        grid=(B,),
        in_specs=[
            pl.BlockSpec((1, T, D), lambda i: (i, 0, 0)),
            pl.BlockSpec((1, D), lambda i: (0, 0)),
            pl.BlockSpec((1, D), lambda i: (0, 0)),
            pl.BlockSpec((D, 3 * D), lambda i: (0, 0)),
            pl.BlockSpec((1, 3 * D), lambda i: (0, 0)),
            pl.BlockSpec((D, D), lambda i: (0, 0)),
            pl.BlockSpec((1, D), lambda i: (0, 0)),
        ],
        out_specs=pl.BlockSpec((1, T, D), lambda i: (i, 0, 0)),
        compiler_params=pltpu.CompilerParams(
            dimension_semantics=("parallel",),
            vmem_limit_bytes=_VMEM_LIMIT),
    )(tokens, g, b, wqkv, bqkv, wo, bo)


def _mlp_seg(tokens, params, bm, nc_pad, eps=1e-5):
    Mp, D = tokens.shape
    H4 = params["w_mlp1"].shape[1]
    nc = params["w_seg"].shape[1]
    g = params["ln2_g"].reshape(1, D).astype(jnp.float32)
    b = params["ln2_b"].reshape(1, D).astype(jnp.float32)
    w1 = params["w_mlp1"].astype(jnp.bfloat16)
    b1 = params["b_mlp1"].reshape(1, H4).astype(jnp.float32)
    w2 = params["w_mlp2"].astype(jnp.bfloat16)
    b2 = params["b_mlp2"].reshape(1, D).astype(jnp.float32)
    wseg = jnp.pad(params["w_seg"], ((0, 0), (0, nc_pad - nc))).astype(jnp.bfloat16)
    bseg = jnp.pad(params["b_seg"], (0, nc_pad - nc)).reshape(1, nc_pad).astype(jnp.float32)
    return pl.pallas_call(
        functools.partial(_mlp_seg_kernel, eps=eps),
        out_shape=jax.ShapeDtypeStruct((Mp, nc_pad), jnp.float32),
        grid=(Mp // bm,),
        in_specs=[
            pl.BlockSpec((bm, D), lambda i: (i, 0)),
            pl.BlockSpec((1, D), lambda i: (0, 0)),
            pl.BlockSpec((1, D), lambda i: (0, 0)),
            pl.BlockSpec((D, H4), lambda i: (0, 0)),
            pl.BlockSpec((1, H4), lambda i: (0, 0)),
            pl.BlockSpec((H4, D), lambda i: (0, 0)),
            pl.BlockSpec((1, D), lambda i: (0, 0)),
            pl.BlockSpec((D, nc_pad), lambda i: (0, 0)),
            pl.BlockSpec((1, nc_pad), lambda i: (0, 0)),
        ],
        out_specs=pl.BlockSpec((bm, nc_pad), lambda i: (i, 0)),
        compiler_params=pltpu.CompilerParams(
            dimension_semantics=("parallel",),
            vmem_limit_bytes=_VMEM_LIMIT),
    )(tokens, g, b, w1, b1, w2, b2, wseg, bseg)


# ------------------------------ model glue ---------------------------------

def init_params(key, c_in, dim_last, heads, num_classes):
    D = dim_last
    half = D // 2
    ks = jax.random.split(key, 8)
    w = lambda k, s: jax.random.normal(k, s, jnp.float32) * 0.02
    z = lambda n: jnp.zeros((n,), jnp.float32)
    o = lambda n: jnp.ones((n,), jnp.float32)
    return dict(
        w_embed4=w(ks[0], (c_in * 16, half)), b_embed4=z(half),
        w_embed8=w(ks[1], (c_in * 64, half)), b_embed8=z(half),
        ln1_g=o(D), ln1_b=z(D),
        w_qkv=w(ks[2], (D, 3 * D)), b_qkv=z(3 * D),
        w_attn_out=w(ks[3], (D, D)), b_attn_out=z(D),
        ln2_g=o(D), ln2_b=z(D),
        w_mlp1=w(ks[4], (D, 4 * D)), b_mlp1=z(4 * D),
        w_mlp2=w(ks[5], (4 * D, D)), b_mlp2=z(D),
        w_seg=w(ks[6], (D, num_classes)), b_seg=z(num_classes),
    )


def crossformer_segmentation_forward(x, params, *, dim_last, heads, num_classes):
    B, C, H, W = x.shape
    Hf, Wf = H // 4, W // 4
    D = dim_last
    T = Hf * Wf
    M = B * T

    # ---- cross-scale patch extraction (im2col glue; matmuls run in Pallas) ----
    p4 = lax.conv_general_dilated_patches(x, (4, 4), (4, 4), "VALID")            # (B, C*16, Hf, Wf)
    p8 = lax.conv_general_dilated_patches(x, (8, 8), (4, 4), ((2, 2), (2, 2)))   # (B, C*64, Hf, Wf)
    p4 = p4.transpose(0, 2, 3, 1).reshape(M, -1).astype(jnp.bfloat16)
    p8 = p8.transpose(0, 2, 3, 1).reshape(M, -1).astype(jnp.bfloat16)

    bm, Mp = _pick_block_m(M)
    if Mp != M:                       # pad once (no-op at the demo shapes)
        p4 = jnp.pad(p4, ((0, Mp - M), (0, 0)))
        p8 = jnp.pad(p8, ((0, Mp - M), (0, 0)))

    # ---- fused cross-scale embed: tokens (Mp, D) in bf16 ----
    tokens = _embed(p4, p8, params, bm)
    tokens = tokens[:M].reshape(B, T, D)

    # ---- fused pre-LN MHSA block: LN1 + QKV + attention + proj + residual ----
    tokens = _attn_block(tokens, params, heads)                                  # (B, T, D) bf16

    # ---- fused pre-LN MLP block + residual + 1x1-conv segmentation head ----
    tokens = tokens.reshape(M, D)
    if Mp != M:
        tokens = jnp.pad(tokens, ((0, Mp - M), (0, 0)))
    nc_pad = _round_up(max(num_classes, 128), 128)
    logits = _mlp_seg(tokens, params, bm, nc_pad)                                # (Mp, nc_pad) f32
    logits = logits[:M, :num_classes]
    logits = logits.reshape(B, Hf, Wf, num_classes).transpose(0, 3, 1, 2)        # (B, NC, Hf, Wf)

    # ---- nearest upsample to input size: pure replication gather (no matmuls) ----
    row = (jnp.arange(H) * Hf // H).astype(jnp.int32)
    col = (jnp.arange(W) * Wf // W).astype(jnp.int32)
    seg = logits[:, :, row, :][:, :, :, col]                                     # (B, NC, H, W)
    return seg


# --------------------------------- main -------------------------------------

if __name__ == "__main__":
    key = jax.random.PRNGKey(0)
    B, C, H, W = 2, 3, 16, 16
    dim = (32, 64, 96, 128)         # self.dim; only dim[-1] is used in forward
    heads = 4
    num_classes = 5

    kx, kp = jax.random.split(key)
    x = jax.random.normal(kx, (B, C, H, W), jnp.float32)
    params = init_params(kp, C, dim[-1], heads, num_classes)

    fwd = jax.jit(functools.partial(
        crossformer_segmentation_forward,
        dim_last=dim[-1], heads=heads, num_classes=num_classes))
    out = fwd(x, params)
    out = jax.block_until_ready(out)
    assert out.shape == (B, num_classes, H, W), out.shape
    assert bool(jnp.all(jnp.isfinite(out)))
    print("KERNEL_OK")
</pallas_src>

<mosaic_0001>
module attributes {stable_mosaic.version = 11 : i64} {
  func.func @_embed_kernel(%arg0: i32, %arg1: memref<32x48xbf16, #tpu.memory_space<vmem>>, %arg2: memref<32x192xbf16, #tpu.memory_space<vmem>>, %arg3: memref<48x64xbf16, #tpu.memory_space<vmem>>, %arg4: memref<1x64xf32, #tpu.memory_space<vmem>>, %arg5: memref<192x64xbf16, #tpu.memory_space<vmem>>, %arg6: memref<1x64xf32, #tpu.memory_space<vmem>>, %arg7: memref<32x128xbf16, #tpu.memory_space<vmem>>) attributes {dimension_semantics = [#tpu.dimension_semantics<parallel>], iteration_bounds = array<i64: 1>, scalar_prefetch = 0 : i64, scratch_operands = 0 : i64, tpu.core_type = #tpu.core_type<tc>, window_params = [{transform_indices = @transform_0, window_bounds = array<i64: 32, 48>}, {transform_indices = @transform_1, window_bounds = array<i64: 32, 192>}, {pipeline_mode = #tpu.pipeline_mode<synchronous>, transform_indices = @transform_2, window_bounds = array<i64: 48, 64>}, {pipeline_mode = #tpu.pipeline_mode<synchronous>, transform_indices = @transform_3, window_bounds = array<i64: 1, 64>}, {pipeline_mode = #tpu.pipeline_mode<synchronous>, transform_indices = @transform_4, window_bounds = array<i64: 192, 64>}, {pipeline_mode = #tpu.pipeline_mode<synchronous>, transform_indices = @transform_5, window_bounds = array<i64: 1, 64>}, {transform_indices = @transform_6, window_bounds = array<i64: 32, 128>}]} {
    %c0 = arith.constant 0 : index
    %c0_0 = arith.constant 0 : index
    %0 = vector.load %arg1[%c0, %c0_0] : memref<32x48xbf16, #tpu.memory_space<vmem>>, vector<32x48xbf16>
    %c0_1 = arith.constant 0 : index
    %c0_2 = arith.constant 0 : index
    %1 = vector.load %arg3[%c0_1, %c0_2] : memref<48x64xbf16, #tpu.memory_space<vmem>>, vector<48x64xbf16>
    %cst = arith.constant dense<0.000000e+00> : vector<32x64xf32>
    %2 = tpu.matmul %0, %1, %cst {dimension_numbers = #tpu.dot_dimension_numbers<[1], [0], [0], [1], [0, 0, 1, 1], [], []>} : vector<32x48xbf16>, vector<48x64xbf16>, vector<32x64xf32> -> vector<32x64xf32>
    %c0_3 = arith.constant 0 : index
    %c0_4 = arith.constant 0 : index
    %3 = vector.load %arg4[%c0_3, %c0_4] : memref<1x64xf32, #tpu.memory_space<vmem>>, vector<1x64xf32>
    %4 = vector.broadcast %3 : vector<1x64xf32> to vector<32x64xf32>
    %5 = arith.addf %2, %4 : vector<32x64xf32>
    %c0_5 = arith.constant 0 : index
    %c0_6 = arith.constant 0 : index
    %6 = vector.load %arg2[%c0_5, %c0_6] : memref<32x192xbf16, #tpu.memory_space<vmem>>, vector<32x192xbf16>
    %c0_7 = arith.constant 0 : index
    %c0_8 = arith.constant 0 : index
    %7 = vector.load %arg5[%c0_7, %c0_8] : memref<192x64xbf16, #tpu.memory_space<vmem>>, vector<192x64xbf16>
    %cst_9 = arith.constant dense<0.000000e+00> : vector<32x64xf32>
    %8 = tpu.matmul %6, %7, %cst_9 {dimension_numbers = #tpu.dot_dimension_numbers<[1], [0], [0], [1], [0, 0, 1, 1], [], []>} : vector<32x192xbf16>, vector<192x64xbf16>, vector<32x64xf32> -> vector<32x64xf32>
    %c0_10 = arith.constant 0 : index
    %c0_11 = arith.constant 0 : index
    %9 = vector.load %arg6[%c0_10, %c0_11] : memref<1x64xf32, #tpu.memory_space<vmem>>, vector<1x64xf32>
    %10 = vector.broadcast %9 : vector<1x64xf32> to vector<32x64xf32>
    %11 = arith.addf %8, %10 : vector<32x64xf32>
    %12 = tpu.concatenate %5, %11 in 1 : vector<32x64xf32>, vector<32x64xf32> -> vector<32x128xf32>
    %13 = arith.truncf %12 : vector<32x128xf32> to vector<32x128xbf16>
    %c0_12 = arith.constant 0 : index
    %c0_13 = arith.constant 0 : index
    %14 = vector.load %arg7[%c0_12, %c0_13] : memref<32x128xbf16, #tpu.memory_space<vmem>>, vector<32x128xbf16>
    tpu.vector_store %arg7[%c0_12, %c0_13], %13 {strides = array<i32>} : memref<32x128xbf16, #tpu.memory_space<vmem>>, vector<32x128xbf16>,
    return
  }
  func.func @transform_0(%arg0: i32) -> (i32, i32) {
    %c0_i32 = arith.constant 0 : i32
    %c0_i32_0 = arith.constant 0 : i32
    return %arg0, %c0_i32 : i32, i32
  }
  func.func @transform_1(%arg0: i32) -> (i32, i32) {
    %c0_i32 = arith.constant 0 : i32
    %c0_i32_0 = arith.constant 0 : i32
    return %arg0, %c0_i32 : i32, i32
  }
  func.func @transform_2(%arg0: i32) -> (i32, i32) {
    %c0_i32 = arith.constant 0 : i32
    %c0_i32_0 = arith.constant 0 : i32
    %c0_i32_1 = arith.constant 0 : i32
    return %c0_i32, %c0_i32_0 : i32, i32
  }
  func.func @transform_3(%arg0: i32) -> (i32, i32) {
    %c0_i32 = arith.constant 0 : i32
    %c0_i32_0 = arith.constant 0 : i32
    %c0_i32_1 = arith.constant 0 : i32
    return %c0_i32, %c0_i32_0 : i32, i32
  }
  func.func @transform_4(%arg0: i32) -> (i32, i32) {
    %c0_i32 = arith.constant 0 : i32
    %c0_i32_0 = arith.constant 0 : i32
    %c0_i32_1 = arith.constant 0 : i32
    return %c0_i32, %c0_i32_0 : i32, i32
  }
  func.func @transform_5(%arg0: i32) -> (i32, i32) {
    %c0_i32 = arith.constant 0 : i32
    %c0_i32_0 = arith.constant 0 : i32
    %c0_i32_1 = arith.constant 0 : i32
    return %c0_i32, %c0_i32_0 : i32, i32
  }
  func.func @transform_6(%arg0: i32) -> (i32, i32) {
    %c0_i32 = arith.constant 0 : i32
    %c0_i32_0 = arith.constant 0 : i32
    return %arg0, %c0_i32 : i32, i32
  }
}

module attributes {stable_mosaic.version = 11 : i64} {
  func.func @_attn_block_kernel(%arg0: i32, %arg1: memref<1x16x128xbf16, #tpu.memory_space<vmem>>, %arg2: memref<1x128xf32, #tpu.memory_space<vmem>>, %arg3: memref<1x128xf32, #tpu.memory_space<vmem>>, %arg4: memref<128x384xbf16, #tpu.memory_space<vmem>>, %arg5: memref<1x384xf32, #tpu.memory_space<vmem>>, %arg6: memref<128x128xbf16, #tpu.memory_space<vmem>>, %arg7: memref<1x128xf32, #tpu.memory_space<vmem>>, %arg8: memref<1x16x128xbf16, #tpu.memory_space<vmem>>) attributes {dimension_semantics = [#tpu.dimension_semantics<parallel>], iteration_bounds = array<i64: 2>, scalar_prefetch = 0 : i64, scratch_operands = 0 : i64, tpu.core_type = #tpu.core_type<tc>, window_params = [{transform_indices = @transform_0, window_bounds = array<i64: 1, 16, 128>}, {pipeline_mode = #tpu.pipeline_mode<synchronous>, transform_indices = @transform_1, window_bounds = array<i64: 1, 128>}, {pipeline_mode = #tpu.pipeline_mode<synchronous>, transform_indices = @transform_2, window_bounds = array<i64: 1, 128>}, {pipeline_mode = #tpu.pipeline_mode<synchronous>, transform_indices = @transform_3, window_bounds = array<i64: 128, 384>}, {pipeline_mode = #tpu.pipeline_mode<synchronous>, transform_indices = @transform_4, window_bounds = array<i64: 1, 384>}, {pipeline_mode = #tpu.pipeline_mode<synchronous>, transform_indices = @transform_5, window_bounds = array<i64: 128, 128>}, {pipeline_mode = #tpu.pipeline_mode<synchronous>, transform_indices = @transform_6, window_bounds = array<i64: 1, 128>}, {transform_indices = @transform_7, window_bounds = array<i64: 1, 16, 128>}]} {
    %c0 = arith.constant 0 : index
    %c0_0 = arith.constant 0 : index
    %c0_1 = arith.constant 0 : index
    %0 = vector.load %arg1[%c0, %c0_0, %c0_1] : memref<1x16x128xbf16, #tpu.memory_space<vmem>>, vector<1x16x128xbf16>
    %1 = vector.shape_cast %0 : vector<1x16x128xbf16> to vector<16x128xbf16>
    %2 = arith.extf %1 : vector<16x128xbf16> to vector<16x128xf32>
    %cst = arith.constant dense<0.000000e+00> : vector<16xf32>
    %3 = vector.multi_reduction <add>, %2, %cst [1] : vector<16x128xf32> to vector<16xf32>
    %4 = vector.shape_cast %3 : vector<16xf32> to vector<16x1xf32>
    %cst_2 = arith.constant 1.280000e+02 : f32
    %5 = vector.broadcast %cst_2 : f32 to vector<16x1xf32>
    %6 = arith.divf %4, %5 : vector<16x1xf32>
    %7 = vector.broadcast %6 : vector<16x1xf32> to vector<16x128xf32>
    %8 = arith.subf %2, %7 : vector<16x128xf32>
    %9 = arith.mulf %8, %8 : vector<16x128xf32>
    %cst_3 = arith.constant dense<0.000000e+00> : vector<16xf32>
    %10 = vector.multi_reduction <add>, %9, %cst_3 [1] : vector<16x128xf32> to vector<16xf32>
    %11 = vector.shape_cast %10 : vector<16xf32> to vector<16x1xf32>
    %cst_4 = arith.constant 1.280000e+02 : f32
    %12 = vector.broadcast %cst_4 : f32 to vector<16x1xf32>
    %13 = arith.divf %11, %12 : vector<16x1xf32>
    %14 = vector.broadcast %6 : vector<16x1xf32> to vector<16x128xf32>
    %15 = arith.subf %2, %14 : vector<16x128xf32>
    %cst_5 = arith.constant 9.99999974E-6 : f32
    %16 = vector.broadcast %cst_5 : f32 to vector<16x1xf32>
    %17 = arith.addf %13, %16 : vector<16x1xf32>
    %18 = math.rsqrt %17 : vector<16x1xf32>
    %19 = vector.broadcast %18 : vector<16x1xf32> to vector<16x128xf32>
    %20 = arith.mulf %15, %19 : vector<16x128xf32>
    %c0_6 = arith.constant 0 : index
    %c0_7 = arith.constant 0 : index
    %21 = vector.load %arg2[%c0_6, %c0_7] : memref<1x128xf32, #tpu.memory_space<vmem>>, vector<1x128xf32>
    %22 = vector.broadcast %21 : vector<1x128xf32> to vector<16x128xf32>
    %23 = arith.mulf %20, %22 : vector<16x128xf32>
    %c0_8 = arith.constant 0 : index
    %c0_9 = arith.constant 0 : index
    %24 = vector.load %arg3[%c0_8, %c0_9] : memref<1x128xf32, #tpu.memory_space<vmem>>, vector<1x128xf32>
    %25 = vector.broadcast %24 : vector<1x128xf32> to vector<16x128xf32>
    %26 = arith.addf %23, %25 : vector<16x128xf32>
    %27 = arith.truncf %26 : vector<16x128xf32> to vector<16x128xbf16>
    %c0_10 = arith.constant 0 : index
    %c0_11 = arith.constant 0 : index
    %28 = vector.load %arg4[%c0_10, %c0_11] : memref<128x384xbf16, #tpu.memory_space<vmem>>, vector<128x384xbf16>
    %cst_12 = arith.constant dense<0.000000e+00> : vector<16x384xf32>
    %29 = tpu.matmul %27, %28, %cst_12 {dimension_numbers = #tpu.dot_dimension_numbers<[1], [0], [0], [1], [0, 0, 1, 1], [], []>} : vector<16x128xbf16>, vector<128x384xbf16>, vector<16x384xf32> -> vector<16x384xf32>
    %c0_13 = arith.constant 0 : index
    %c0_14 = arith.constant 0 : index
    %30 = vector.load %arg5[%c0_13, %c0_14] : memref<1x384xf32, #tpu.memory_space<vmem>>, vector<1x384xf32>
    %31 = vector.broadcast %30 : vector<1x384xf32> to vector<16x384xf32>
    %32 = arith.addf %29, %31 : vector<16x384xf32>
    %33 = vector.extract_strided_slice %32 {offsets = [0, 0], sizes = [16, 32], strides = [1, 1]} : vector<16x384xf32> to vector<16x32xf32>
    %34 = vector.extract_strided_slice %32 {offsets = [0, 128], sizes = [16, 32], strides = [1, 1]} : vector<16x384xf32> to vector<16x32xf32>
    %35 = vector.extract_strided_slice %32 {offsets = [0, 256], sizes = [16, 32], strides = [1, 1]} : vector<16x384xf32> to vector<16x32xf32>
    %36 = arith.truncf %33 : vector<16x32xf32> to vector<16x32xbf16>
    %37 = arith.truncf %34 : vector<16x32xf32> to vector<16x32xbf16>
    %38 = tpu.transpose %37, [1, 0] : vector<16x32xbf16> -> vector<32x16xbf16>
    %cst_15 = arith.constant dense<0.000000e+00> : vector<16x16xf32>
    %39 = tpu.matmul %36, %38, %cst_15 {dimension_numbers = #tpu.dot_dimension_numbers<[1], [0], [0], [1], [0, 0, 1, 1], [], []>} : vector<16x32xbf16>, vector<32x16xbf16>, vector<16x16xf32> -> vector<16x16xf32>
    %cst_16 = arith.constant 0.176776692 : f32
    %40 = vector.broadcast %cst_16 : f32 to vector<16x16xf32>
    %41 = arith.mulf %39, %40 : vector<16x16xf32>
    %cst_17 = arith.constant dense<0xFF800000> : vector<16xf32>
    %42 = vector.multi_reduction <maximumf>, %41, %cst_17 [1] : vector<16x16xf32> to vector<16xf32>
    %43 = vector.shape_cast %42 : vector<16xf32> to vector<16x1xf32>
    %44 = vector.broadcast %43 : vector<16x1xf32> to vector<16x16xf32>
    %45 = arith.subf %41, %44 : vector<16x16xf32>
    %46 = math.exp %45 : vector<16x16xf32>
    %cst_18 = arith.constant dense<0.000000e+00> : vector<16xf32>
    %47 = vector.multi_reduction <add>, %46, %cst_18 [1] : vector<16x16xf32> to vector<16xf32>
    %48 = vector.shape_cast %47 : vector<16xf32> to vector<16x1xf32>
    %49 = tpu.reciprocal %48 {approx = true} : vector<16x1xf32> -> vector<16x1xf32>
    %50 = vector.broadcast %49 : vector<16x1xf32> to vector<16x16xf32>
    %51 = arith.mulf %46, %50 : vector<16x16xf32>
    %52 = arith.truncf %51 : vector<16x16xf32> to vector<16x16xbf16>
    %53 = arith.truncf %35 : vector<16x32xf32> to vector<16x32xbf16>
    %cst_19 = arith.constant dense<0.000000e+00> : vector<16x32xf32>
    %54 = tpu.matmul %52, %53, %cst_19 {dimension_numbers = #tpu.dot_dimension_numbers<[1], [0], [0], [1], [0, 0, 1, 1], [], []>} : vector<16x16xbf16>, vector<16x32xbf16>, vector<16x32xf32> -> vector<16x32xf32>
    %55 = vector.extract_strided_slice %32 {offsets = [0, 32], sizes = [16, 32], strides = [1, 1]} : vector<16x384xf32> to vector<16x32xf32>
    %56 = vector.extract_strided_slice %32 {offsets = [0, 160], sizes = [16, 32], strides = [1, 1]} : vector<16x384xf32> to vector<16x32xf32>
    %57 = vector.extract_strided_slice %32 {offsets = [0, 288], sizes = [16, 32], strides = [1, 1]} : vector<16x384xf32> to vector<16x32xf32>
    %58 = arith.truncf %55 : vector<16x32xf32> to vector<16x32xbf16>
    %59 = arith.truncf %56 : vector<16x32xf32> to vector<16x32xbf16>
    %60 = tpu.transpose %59, [1, 0] : vector<16x32xbf16> -> vector<32x16xbf16>
    %cst_20 = arith.constant dense<0.000000e+00> : vector<16x16xf32>
    %61 = tpu.matmul %58, %60, %cst_20 {dimension_numbers = #tpu.dot_dimension_numbers<[1], [0], [0], [1], [0, 0, 1, 1], [], []>} : vector<16x32xbf16>, vector<32x16xbf16>, vector<16x16xf32> -> vector<16x16xf32>
    %cst_21 = arith.constant 0.176776692 : f32
    %62 = vector.broadcast %cst_21 : f32 to vector<16x16xf32>
    %63 = arith.mulf %61, %62 : vector<16x16xf32>
    %cst_22 = arith.constant dense<0xFF800000> : vector<16xf32>
    %64 = vector.multi_reduction <maximumf>, %63, %cst_22 [1] : vector<16x16xf32> to vector<16xf32>
    %65 = vector.shape_cast %64 : vector<16xf32> to vector<16x1xf32>
    %66 = vector.broadcast %65 : vector<16x1xf32> to vector<16x16xf32>
    %67 = arith.subf %63, %66 : vector<16x16xf32>
    %68 = math.exp %67 : vector<16x16xf32>
    %cst_23 = arith.constant dense<0.000000e+00> : vector<16xf32>
    %69 = vector.multi_reduction <add>, %68, %cst_23 [1] : vector<16x16xf32> to vector<16xf32>
    %70 = vector.shape_cast %69 : vector<16xf32> to vector<16x1xf32>
    %71 = tpu.reciprocal %70 {approx = true} : vector<16x1xf32> -> vector<16x1xf32>
    %72 = vector.broadcast %71 : vector<16x1xf32> to vector<16x16xf32>
    %73 = arith.mulf %68, %72 : vector<16x16xf32>
    %74 = arith.truncf %73 : vector<16x16xf32> to vector<16x16xbf16>
    %75 = arith.truncf %57 : vector<16x32xf32> to vector<16x32xbf16>
    %cst_24 = arith.constant dense<0.000000e+00> : vector<16x32xf32>
    %76 = tpu.matmul %74, %75, %cst_24 {dimension_numbers = #tpu.dot_dimension_numbers<[1], [0], [0], [1], [0, 0, 1, 1], [], []>} : vector<16x16xbf16>, vector<16x32xbf16>, vector<16x32xf32> -> vector<16x32xf32>
    %77 = vector.extract_strided_slice %32 {offsets = [0, 64], sizes = [16, 32], strides = [1, 1]} : vector<16x384xf32> to vector<16x32xf32>
    %78 = vector.extract_strided_slice %32 {offsets = [0, 192], sizes = [16, 32], strides = [1, 1]} : vector<16x384xf32> to vector<16x32xf32>
    %79 = vector.extract_strided_slice %32 {offsets = [0, 320], sizes = [16, 32], strides = [1, 1]} : vector<16x384xf32> to vector<16x32xf32>
    %80 = arith.truncf %77 : vector<16x32xf32> to vector<16x32xbf16>
    %81 = arith.truncf %78 : vector<16x32xf32> to vector<16x32xbf16>
    %82 = tpu.transpose %81, [1, 0] : vector<16x32xbf16> -> vector<32x16xbf16>
    %cst_25 = arith.constant dense<0.000000e+00> : vector<16x16xf32>
    %83 = tpu.matmul %80, %82, %cst_25 {dimension_numbers = #tpu.dot_dimension_numbers<[1], [0], [0], [1], [0, 0, 1, 1], [], []>} : vector<16x32xbf16>, vector<32x16xbf16>, vector<16x16xf32> -> vector<16x16xf32>
    %cst_26 = arith.constant 0.176776692 : f32
    %84 = vector.broadcast %cst_26 : f32 to vector<16x16xf32>
    %85 = arith.mulf %83, %84 : vector<16x16xf32>
    %cst_27 = arith.constant dense<0xFF800000> : vector<16xf32>
    %86 = vector.multi_reduction <maximumf>, %85, %cst_27 [1] : vector<16x16xf32> to vector<16xf32>
    %87 = vector.shape_cast %86 : vector<16xf32> to vector<16x1xf32>
    %88 = vector.broadcast %87 : vector<16x1xf32> to vector<16x16xf32>
    %89 = arith.subf %85, %88 : vector<16x16xf32>
    %90 = math.exp %89 : vector<16x16xf32>
    %cst_28 = arith.constant dense<0.000000e+00> : vector<16xf32>
    %91 = vector.multi_reduction <add>, %90, %cst_28 [1] : vector<16x16xf32> to vector<16xf32>
    %92 = vector.shape_cast %91 : vector<16xf32> to vector<16x1xf32>
    %93 = tpu.reciprocal %92 {approx = true} : vector<16x1xf32> -> vector<16x1xf32>
    %94 = vector.broadcast %93 : vector<16x1xf32> to vector<16x16xf32>
    %95 = arith.mulf %90, %94 : vector<16x16xf32>
    %96 = arith.truncf %95 : vector<16x16xf32> to vector<16x16xbf16>
    %97 = arith.truncf %79 : vector<16x32xf32> to vector<16x32xbf16>
    %cst_29 = arith.constant dense<0.000000e+00> : vector<16x32xf32>
    %98 = tpu.matmul %96, %97, %cst_29 {dimension_numbers = #tpu.dot_dimension_numbers<[1], [0], [0], [1], [0, 0, 1, 1], [], []>} : vector<16x16xbf16>, vector<16x32xbf16>, vector<16x32xf32> -> vector<16x32xf32>
    %99 = vector.extract_strided_slice %32 {offsets = [0, 96], sizes = [16, 32], strides = [1, 1]} : vector<16x384xf32> to vector<16x32xf32>
    %100 = vector.extract_strided_slice %32 {offsets = [0, 224], sizes = [16, 32], strides = [1, 1]} : vector<16x384xf32> to vector<16x32xf32>
    %101 = vector.extract_strided_slice %32 {offsets = [0, 352], sizes = [16, 32], strides = [1, 1]} : vector<16x384xf32> to vector<16x32xf32>
    %102 = arith.truncf %99 : vector<16x32xf32> to vector<16x32xbf16>
    %103 = arith.truncf %100 : vector<16x32xf32> to vector<16x32xbf16>
    %104 = tpu.transpose %103, [1, 0] : vector<16x32xbf16> -> vector<32x16xbf16>
    %cst_30 = arith.constant dense<0.000000e+00> : vector<16x16xf32>
    %105 = tpu.matmul %102, %104, %cst_30 {dimension_numbers = #tpu.dot_dimension_numbers<[1], [0], [0], [1], [0, 0, 1, 1], [], []>} : vector<16x32xbf16>, vector<32x16xbf16>, vector<16x16xf32> -> vector<16x16xf32>
    %cst_31 = arith.constant 0.176776692 : f32
    %106 = vector.broadcast %cst_31 : f32 to vector<16x16xf32>
    %107 = arith.mulf %105, %106 : vector<16x16xf32>
    %cst_32 = arith.constant dense<0xFF800000> : vector<16xf32>
    %108 = vector.multi_reduction <maximumf>, %107, %cst_32 [1] : vector<16x16xf32> to vector<16xf32>
    %109 = vector.shape_cast %108 : vector<16xf32> to vector<16x1xf32>
    %110 = vector.broadcast %109 : vector<16x1xf32> to vector<16x16xf32>
    %111 = arith.subf %107, %110 : vector<16x16xf32>
    %112 = math.exp %111 : vector<16x16xf32>
    %cst_33 = arith.constant dense<0.000000e+00> : vector<16xf32>
    %113 = vector.multi_reduction <add>, %112, %cst_33 [1] : vector<16x16xf32> to vector<16xf32>
    %114 = vector.shape_cast %113 : vector<16xf32> to vector<16x1xf32>
    %115 = tpu.reciprocal %114 {approx = true} : vector<16x1xf32> -> vector<16x1xf32>
    %116 = vector.broadcast %115 : vector<16x1xf32> to vector<16x16xf32>
    %117 = arith.mulf %112, %116 : vector<16x16xf32>
    %118 = arith.truncf %117 : vector<16x16xf32> to vector<16x16xbf16>
    %119 = arith.truncf %101 : vector<16x32xf32> to vector<16x32xbf16>
    %cst_34 = arith.constant dense<0.000000e+00> : vector<16x32xf32>
    %120 = tpu.matmul %118, %119, %cst_34 {dimension_numbers = #tpu.dot_dimension_numbers<[1], [0], [0], [1], [0, 0, 1, 1], [], []>} : vector<16x16xbf16>, vector<16x32xbf16>, vector<16x32xf32> -> vector<16x32xf32>
    %121 = tpu.concatenate %54, %76, %98, %120 in 1 : vector<16x32xf32>, vector<16x32xf32>, vector<16x32xf32>, vector<16x32xf32> -> vector<16x128xf32>
    %122 = arith.truncf %121 : vector<16x128xf32> to vector<16x128xbf16>
    %c0_35 = arith.constant 0 : index
    %c0_36 = arith.constant 0 : index
    %123 = vector.load %arg6[%c0_35, %c0_36] : memref<128x128xbf16, #tpu.memory_space<vmem>>, vector<128x128xbf16>
    %cst_37 = arith.constant dense<0.000000e+00> : vector<16x128xf32>
    %124 = tpu.matmul %122, %123, %cst_37 {dimension_numbers = #tpu.dot_dimension_numbers<[1], [0], [0], [1], [0, 0, 1, 1], [], []>} : vector<16x128xbf16>, vector<128x128xbf16>, vector<16x128xf32> -> vector<16x128xf32>
    %c0_38 = arith.constant 0 : index
    %c0_39 = arith.constant 0 : index
    %125 = vector.load %arg7[%c0_38, %c0_39] : memref<1x128xf32, #tpu.memory_space<vmem>>, vector<1x128xf32>
    %126 = vector.broadcast %125 : vector<1x128xf32> to vector<16x128xf32>
    %127 = arith.addf %124, %126 : vector<16x128xf32>
    %128 = arith.addf %2, %127 : vector<16x128xf32>
    %129 = arith.truncf %128 : vector<16x128xf32> to vector<16x128xbf16>
    %c0_40 = arith.constant 0 : index
    %c0_41 = arith.constant 0 : index
    %c0_42 = arith.constant 0 : index
    %130 = vector.load %arg8[%c0_40, %c0_41, %c0_42] : memref<1x16x128xbf16, #tpu.memory_space<vmem>>, vector<1x16x128xbf16>
    %131 = vector.shape_cast %130 : vector<1x16x128xbf16> to vector<16x128xbf16>
    %132 = vector.shape_cast %129 : vector<16x128xbf16> to vector<1x16x128xbf16>
    tpu.vector_store %arg8[%c0_40, %c0_41, %c0_42], %132 {strides = array<i32>} : memref<1x16x128xbf16, #tpu.memory_space<vmem>>, vector<1x16x128xbf16>,
    return
  }
  func.func @transform_0(%arg0: i32) -> (i32, i32, i32) {
    %c0_i32 = arith.constant 0 : i32
    %c0_i32_0 = arith.constant 0 : i32
    %c0_i32_1 = arith.constant 0 : i32
    return %arg0, %c0_i32, %c0_i32_0 : i32, i32, i32
  }
  func.func @transform_1(%arg0: i32) -> (i32, i32) {
    %c0_i32 = arith.constant 0 : i32
    %c0_i32_0 = arith.constant 0 : i32
    %c0_i32_1 = arith.constant 0 : i32
    return %c0_i32, %c0_i32_0 : i32, i32
  }
  func.func @transform_2(%arg0: i32) -> (i32, i32) {
    %c0_i32 = arith.constant 0 : i32
    %c0_i32_0 = arith.constant 0 : i32
    %c0_i32_1 = arith.constant 0 : i32
    return %c0_i32, %c0_i32_0 : i32, i32
  }
  func.func @transform_3(%arg0: i32) -> (i32, i32) {
    %c0_i32 = arith.constant 0 : i32
    %c0_i32_0 = arith.constant 0 : i32
    %c0_i32_1 = arith.constant 0 : i32
    return %c0_i32, %c0_i32_0 : i32, i32
  }
  func.func @transform_4(%arg0: i32) -> (i32, i32) {
    %c0_i32 = arith.constant 0 : i32
    %c0_i32_0 = arith.constant 0 : i32
    %c0_i32_1 = arith.constant 0 : i32
    return %c0_i32, %c0_i32_0 : i32, i32
  }
  func.func @transform_5(%arg0: i32) -> (i32, i32) {
    %c0_i32 = arith.constant 0 : i32
    %c0_i32_0 = arith.constant 0 : i32
    %c0_i32_1 = arith.constant 0 : i32
    return %c0_i32, %c0_i32_0 : i32, i32
  }
  func.func @transform_6(%arg0: i32) -> (i32, i32) {
    %c0_i32 = arith.constant 0 : i32
    %c0_i32_0 = arith.constant 0 : i32
    %c0_i32_1 = arith.constant 0 : i32
    return %c0_i32, %c0_i32_0 : i32, i32
  }
  func.func @transform_7(%arg0: i32) -> (i32, i32, i32) {
    %c0_i32 = arith.constant 0 : i32
    %c0_i32_0 = arith.constant 0 : i32
    %c0_i32_1 = arith.constant 0 : i32
    return %arg0, %c0_i32, %c0_i32_0 : i32, i32, i32
  }
}

module attributes {stable_mosaic.version = 11 : i64} {
  func.func @_mlp_seg_kernel(%arg0: i32, %arg1: memref<32x128xbf16, #tpu.memory_space<vmem>>, %arg2: memref<1x128xf32, #tpu.memory_space<vmem>>, %arg3: memref<1x128xf32, #tpu.memory_space<vmem>>, %arg4: memref<128x512xbf16, #tpu.memory_space<vmem>>, %arg5: memref<1x512xf32, #tpu.memory_space<vmem>>, %arg6: memref<512x128xbf16, #tpu.memory_space<vmem>>, %arg7: memref<1x128xf32, #tpu.memory_space<vmem>>, %arg8: memref<128x128xbf16, #tpu.memory_space<vmem>>, %arg9: memref<1x128xf32, #tpu.memory_space<vmem>>, %arg10: memref<32x128xf32, #tpu.memory_space<vmem>>) attributes {dimension_semantics = [#tpu.dimension_semantics<parallel>], iteration_bounds = array<i64: 1>, scalar_prefetch = 0 : i64, scratch_operands = 0 : i64, tpu.core_type = #tpu.core_type<tc>, window_params = [{transform_indices = @transform_0, window_bounds = array<i64: 32, 128>}, {pipeline_mode = #tpu.pipeline_mode<synchronous>, transform_indices = @transform_1, window_bounds = array<i64: 1, 128>}, {pipeline_mode = #tpu.pipeline_mode<synchronous>, transform_indices = @transform_2, window_bounds = array<i64: 1, 128>}, {pipeline_mode = #tpu.pipeline_mode<synchronous>, transform_indices = @transform_3, window_bounds = array<i64: 128, 512>}, {pipeline_mode = #tpu.pipeline_mode<synchronous>, transform_indices = @transform_4, window_bounds = array<i64: 1, 512>}, {pipeline_mode = #tpu.pipeline_mode<synchronous>, transform_indices = @transform_5, window_bounds = array<i64: 512, 128>}, {pipeline_mode = #tpu.pipeline_mode<synchronous>, transform_indices = @transform_6, window_bounds = array<i64: 1, 128>}, {pipeline_mode = #tpu.pipeline_mode<synchronous>, transform_indices = @transform_7, window_bounds = array<i64: 128, 128>}, {pipeline_mode = #tpu.pipeline_mode<synchronous>, transform_indices = @transform_8, window_bounds = array<i64: 1, 128>}, {transform_indices = @transform_9, window_bounds = array<i64: 32, 128>}]} {
    %c0 = arith.constant 0 : index
    %c0_0 = arith.constant 0 : index
    %0 = vector.load %arg1[%c0, %c0_0] : memref<32x128xbf16, #tpu.memory_space<vmem>>, vector<32x128xbf16>
    %1 = arith.extf %0 : vector<32x128xbf16> to vector<32x128xf32>
    %cst = arith.constant dense<0.000000e+00> : vector<32xf32>
    %2 = vector.multi_reduction <add>, %1, %cst [1] : vector<32x128xf32> to vector<32xf32>
    %3 = vector.shape_cast %2 : vector<32xf32> to vector<32x1xf32>
    %cst_1 = arith.constant 1.280000e+02 : f32
    %4 = vector.broadcast %cst_1 : f32 to vector<32x1xf32>
    %5 = arith.divf %3, %4 : vector<32x1xf32>
    %6 = vector.broadcast %5 : vector<32x1xf32> to vector<32x128xf32>
    %7 = arith.subf %1, %6 : vector<32x128xf32>
    %8 = arith.mulf %7, %7 : vector<32x128xf32>
    %cst_2 = arith.constant dense<0.000000e+00> : vector<32xf32>
    %9 = vector.multi_reduction <add>, %8, %cst_2 [1] : vector<32x128xf32> to vector<32xf32>
    %10 = vector.shape_cast %9 : vector<32xf32> to vector<32x1xf32>
    %cst_3 = arith.constant 1.280000e+02 : f32
    %11 = vector.broadcast %cst_3 : f32 to vector<32x1xf32>
    %12 = arith.divf %10, %11 : vector<32x1xf32>
    %13 = vector.broadcast %5 : vector<32x1xf32> to vector<32x128xf32>
    %14 = arith.subf %1, %13 : vector<32x128xf32>
    %cst_4 = arith.constant 9.99999974E-6 : f32
    %15 = vector.broadcast %cst_4 : f32 to vector<32x1xf32>
    %16 = arith.addf %12, %15 : vector<32x1xf32>
    %17 = math.rsqrt %16 : vector<32x1xf32>
    %18 = vector.broadcast %17 : vector<32x1xf32> to vector<32x128xf32>
    %19 = arith.mulf %14, %18 : vector<32x128xf32>
    %c0_5 = arith.constant 0 : index
    %c0_6 = arith.constant 0 : index
    %20 = vector.load %arg2[%c0_5, %c0_6] : memref<1x128xf32, #tpu.memory_space<vmem>>, vector<1x128xf32>
    %21 = vector.broadcast %20 : vector<1x128xf32> to vector<32x128xf32>
    %22 = arith.mulf %19, %21 : vector<32x128xf32>
    %c0_7 = arith.constant 0 : index
    %c0_8 = arith.constant 0 : index
    %23 = vector.load %arg3[%c0_7, %c0_8] : memref<1x128xf32, #tpu.memory_space<vmem>>, vector<1x128xf32>
    %24 = vector.broadcast %23 : vector<1x128xf32> to vector<32x128xf32>
    %25 = arith.addf %22, %24 : vector<32x128xf32>
    %26 = arith.truncf %25 : vector<32x128xf32> to vector<32x128xbf16>
    %c0_9 = arith.constant 0 : index
    %c0_10 = arith.constant 0 : index
    %27 = vector.load %arg4[%c0_9, %c0_10] : memref<128x512xbf16, #tpu.memory_space<vmem>>, vector<128x512xbf16>
    %cst_11 = arith.constant dense<0.000000e+00> : vector<32x512xf32>
    %28 = tpu.matmul %26, %27, %cst_11 {dimension_numbers = #tpu.dot_dimension_numbers<[1], [0], [0], [1], [0, 0, 1, 1], [], []>} : vector<32x128xbf16>, vector<128x512xbf16>, vector<32x512xf32> -> vector<32x512xf32>
    %c0_12 = arith.constant 0 : index
    %c0_13 = arith.constant 0 : index
    %29 = vector.load %arg5[%c0_12, %c0_13] : memref<1x512xf32, #tpu.memory_space<vmem>>, vector<1x512xf32>
    %30 = vector.broadcast %29 : vector<1x512xf32> to vector<32x512xf32>
    %31 = arith.addf %28, %30 : vector<32x512xf32>
    %32 = arith.mulf %31, %31 : vector<32x512xf32>
    %33 = arith.mulf %31, %32 : vector<32x512xf32>
    %cst_14 = arith.constant 4.471500e-02 : f32
    %34 = vector.broadcast %cst_14 : f32 to vector<32x512xf32>
    %35 = arith.mulf %34, %33 : vector<32x512xf32>
    %36 = arith.addf %31, %35 : vector<32x512xf32>
    %cst_15 = arith.constant 0.797884583 : f32
    %37 = vector.broadcast %cst_15 : f32 to vector<32x512xf32>
    %38 = arith.mulf %37, %36 : vector<32x512xf32>
    %39 = math.tanh %38 : vector<32x512xf32>
    %cst_16 = arith.constant 1.000000e+00 : f32
    %40 = vector.broadcast %cst_16 : f32 to vector<32x512xf32>
    %41 = arith.addf %40, %39 : vector<32x512xf32>
    %cst_17 = arith.constant 5.000000e-01 : f32
    %42 = vector.broadcast %cst_17 : f32 to vector<32x512xf32>
    %43 = arith.mulf %42, %41 : vector<32x512xf32>
    %44 = arith.mulf %31, %43 : vector<32x512xf32>
    %45 = arith.truncf %44 : vector<32x512xf32> to vector<32x512xbf16>
    %c0_18 = arith.constant 0 : index
    %c0_19 = arith.constant 0 : index
    %46 = vector.load %arg6[%c0_18, %c0_19] : memref<512x128xbf16, #tpu.memory_space<vmem>>, vector<512x128xbf16>
    %cst_20 = arith.constant dense<0.000000e+00> : vector<32x128xf32>
    %47 = tpu.matmul %45, %46, %cst_20 {dimension_numbers = #tpu.dot_dimension_numbers<[1], [0], [0], [1], [0, 0, 1, 1], [], []>} : vector<32x512xbf16>, vector<512x128xbf16>, vector<32x128xf32> -> vector<32x128xf32>
    %c0_21 = arith.constant 0 : index
    %c0_22 = arith.constant 0 : index
    %48 = vector.load %arg7[%c0_21, %c0_22] : memref<1x128xf32, #tpu.memory_space<vmem>>, vector<1x128xf32>
    %49 = vector.broadcast %48 : vector<1x128xf32> to vector<32x128xf32>
    %50 = arith.addf %47, %49 : vector<32x128xf32>
    %51 = arith.addf %1, %50 : vector<32x128xf32>
    %52 = arith.truncf %51 : vector<32x128xf32> to vector<32x128xbf16>
    %c0_23 = arith.constant 0 : index
    %c0_24 = arith.constant 0 : index
    %53 = vector.load %arg8[%c0_23, %c0_24] : memref<128x128xbf16, #tpu.memory_space<vmem>>, vector<128x128xbf16>
    %cst_25 = arith.constant dense<0.000000e+00> : vector<32x128xf32>
    %54 = tpu.matmul %52, %53, %cst_25 {dimension_numbers = #tpu.dot_dimension_numbers<[1], [0], [0], [1], [0, 0, 1, 1], [], []>} : vector<32x128xbf16>, vector<128x128xbf16>, vector<32x128xf32> -> vector<32x128xf32>
    %c0_26 = arith.constant 0 : index
    %c0_27 = arith.constant 0 : index
    %55 = vector.load %arg9[%c0_26, %c0_27] : memref<1x128xf32, #tpu.memory_space<vmem>>, vector<1x128xf32>
    %56 = vector.broadcast %55 : vector<1x128xf32> to vector<32x128xf32>
    %57 = arith.addf %54, %56 : vector<32x128xf32>
    %c0_28 = arith.constant 0 : index
    %c0_29 = arith.constant 0 : index
    %58 = vector.load %arg10[%c0_28, %c0_29] : memref<32x128xf32, #tpu.memory_space<vmem>>, vector<32x128xf32>
    tpu.vector_store %arg10[%c0_28, %c0_29], %57 {strides = array<i32>} : memref<32x128xf32, #tpu.memory_space<vmem>>, vector<32x128xf32>,
    return
  }
  func.func @transform_0(%arg0: i32) -> (i32, i32) {
    %c0_i32 = arith.constant 0 : i32
    %c0_i32_0 = arith.constant 0 : i32
    return %arg0, %c0_i32 : i32, i32
  }
  func.func @transform_1(%arg0: i32) -> (i32, i32) {
    %c0_i32 = arith.constant 0 : i32
    %c0_i32_0 = arith.constant 0 : i32
    %c0_i32_1 = arith.constant 0 : i32
    return %c0_i32, %c0_i32_0 : i32, i32
  }
  func.func @transform_2(%arg0: i32) -> (i32, i32) {
    %c0_i32 = arith.constant 0 : i32
    %c0_i32_0 = arith.constant 0 : i32
    %c0_i32_1 = arith.constant 0 : i32
    return %c0_i32, %c0_i32_0 : i32, i32
  }
  func.func @transform_3(%arg0: i32) -> (i32, i32) {
    %c0_i32 = arith.constant 0 : i32
    %c0_i32_0 = arith.constant 0 : i32
    %c0_i32_1 = arith.constant 0 : i32
    return %c0_i32, %c0_i32_0 : i32, i32
  }
  func.func @transform_4(%arg0: i32) -> (i32, i32) {
    %c0_i32 = arith.constant 0 : i32
    %c0_i32_0 = arith.constant 0 : i32
    %c0_i32_1 = arith.constant 0 : i32
    return %c0_i32, %c0_i32_0 : i32, i32
  }
  func.func @transform_5(%arg0: i32) -> (i32, i32) {
    %c0_i32 = arith.constant 0 : i32
    %c0_i32_0 = arith.constant 0 : i32
    %c0_i32_1 = arith.constant 0 : i32
    return %c0_i32, %c0_i32_0 : i32, i32
  }
  func.func @transform_6(%arg0: i32) -> (i32, i32) {
    %c0_i32 = arith.constant 0 : i32
    %c0_i32_0 = arith.constant 0 : i32
    %c0_i32_1 = arith.constant 0 : i32
    return %c0_i32, %c0_i32_0 : i32, i32
  }
  func.func @transform_7(%arg0: i32) -> (i32, i32) {
    %c0_i32 = arith.constant 0 : i32
    %c0_i32_0 = arith.constant 0 : i32
    %c0_i32_1 = arith.constant 0 : i32
    return %c0_i32, %c0_i32_0 : i32, i32
  }
  func.func @transform_8(%arg0: i32) -> (i32, i32) {
    %c0_i32 = arith.constant 0 : i32
    %c0_i32_0 = arith.constant 0 : i32
    %c0_i32_1 = arith.constant 0 : i32
    return %c0_i32, %c0_i32_0 : i32, i32
  }
  func.func @transform_9(%arg0: i32) -> (i32, i32) {
    %c0_i32 = arith.constant 0 : i32
    %c0_i32_0 = arith.constant 0 : i32
    return %arg0, %c0_i32 : i32, i32
  }
}

</mosaic_0001>

<bundles_post_ra>
// kernel: crossformer_segmentation_forward.3
= control target key start
LH: loop header
LB: loop body
LE: loop exit
PB: predicated region body
PF: predicated region fallthrough
CT: control target
= control target key end

     0   :  { %v446_v0 = vmov 0   ;;  %vm250_vm0 = vcmask 523264   ;;  %vm69_vm1 = vcmask 392192   ;;  %s447_s14 = smov 64   ;;  %s566_s4 = inlined_call_operand.vmem [shape: bf16[192,64], index: 4, kind: input, shape index: {}]   ;;  %s567_s1 = inlined_call_operand.vmem [shape: bf16[32,192], index: 1, kind: input, shape index: {}]   ;;  %s568_s2 = inlined_call_operand.vmem [shape: bf16[48,64], index: 2, kind: input, shape index: {}]   ;;  %s569_s0 = inlined_call_operand.vmem [shape: bf16[32,48], index: 0, kind: input, shape index: {}]   ;;  %s570_s5 = inlined_call_operand.vmem [shape: f32[1,64], index: 5, kind: input, shape index: {}]   ;;  %s571_s3 = inlined_call_operand.vmem [shape: f32[1,64], index: 3, kind: input, shape index: {}]   ;;  %s572_s6 = inlined_call_operand.vmem [shape: bf16[32,128], index: 6, kind: output, shape index: {}]  }
   0x1   :  { %257 = vmatprep.subr.bf16.mxu1 %v446_v0  ;;  %v423_v1 = vld [vmem:[%s566_s4] sm:$0xff]   ;;  %v424_v2 = vld [vmem:[%s566_s4 + $0x8] sm:$0xff]   ;;  %v425_v3 = vld [vmem:[%s566_s4 + $0x10] sm:$0xff]  }
   0x2   :  { %258 = vmatpush1.bf16.msra.mxu1 %v423_v1  ;;  %v426_v4 = vld [vmem:[%s566_s4 + $0x18] sm:$0xff]   ;;  %v437_v5 = vld [vmem:[%s567_s1 + $0x4] ss:$8 sps:$4 sm:$0xff]   ;;  %v443_v11 = vld [vmem:[%s568_s2 + $0x10] sm:$0xff]  }
   0x3   :  { %259 = vmatprep.subr.bf16.mxu1 %v446_v0  ;;  %v427_v6 = vld [vmem:[%s566_s4 + $0x20] sm:$0xff]   ;;  %375 = vmatprep.mubr.msk.bf16.mxu1 %vm250_vm0, %v437_v5  ;;  %v442_v8 = vld [vmem:[%s568_s2 + $0x8] sm:$0xff]   ;;  %v429_v12 = vld [vmem:[%s566_s4 + $0x30] sm:$0xff]  }
   0x4   :  { %v441_v7 = vld [vmem:[%s568_s2] sm:$0xff]   ;;  %v428_v9 = vld [vmem:[%s566_s4 + $0x28] sm:$0xff]   ;;  %v430_v14 = vld [vmem:[%s566_s4 + $0x38] sm:$0xff]  }
   0x5   :  { %401 = vmatprep.subr.bf16.mxu0 %v441_v7  ;;  %v444_v10 = vld [vmem:[%s569_s0] sm:$0xff]   ;;  %v445_v13 = vld [vmem:[%s569_s0 + $0x8] sm:$0xff]   ;;  %v433_v17 = vld [vmem:[%s566_s4 + $0x50] sm:$0xff]  }
   0x6   :  { %260 = vmatpush1.bf16.msra.mxu1 %v424_v2  ;;  %402 = vmatpush3.bf16.msra.mxu0 %v441_v7  ;;  %v431_v15 = vld [vmem:[%s566_s4 + $0x40] sm:$0xff]   ;;  %v432_v16 = vld [vmem:[%s566_s4 + $0x48] sm:$0xff]   ;;  %v434_v18 = vld [vmem:[%s566_s4 + $0x58] sm:$0xff]  }
   0x7   :  { %261 = vmatprep.subr.bf16.mxu1 %v446_v0  ;;  %403 = vmatprep.subr.bf16.mxu0 %v442_v8  ;;  %v435_v19 = vld [vmem:[%s567_s1] ss:$8 sps:$4 sm:$0xff]   ;;  %v438_v20 = vld [vmem:[%s567_s1 + $0x14] ss:$8 sps:$4 sm:$0xff]   ;;  %v440_v21 = vld [vmem:[%s567_s1 + $0x10] ss:$8 sps:$4 sm:$0xff]  }
   0x8   :  { %407 = vmatprep.mubr.msk.bf16.mxu0 %vm69_vm1, %v444_v10  ;;  %v358_v26 = vld [vmem:[%s570_s5] ss:$0 sm:$0xff] }
   0x9   :  { %v350_v41 = vld [vmem:[%s571_s3] ss:$0 sm:$0xff] }
   0xa   :  { %262 = vmatpush1.bf16.msra.mxu1 %v425_v3  ;;  %404 = vmatpush3.bf16.msra.mxu0 %v442_v8 }
   0xb   :  { %263 = vmatprep.subr.bf16.mxu1 %v446_v0  ;;  %405 = vmatprep.subr.bf16.mxu0 %v443_v11 }
   0xe   :  { %264 = vmatpush1.bf16.msra.mxu1 %v426_v4  ;;  %406 = vmatpush3.bf16.msra.mxu0 %v443_v11 }
   0xf   :  { %265 = vmatprep.subr.bf16.mxu1 %v446_v0 }
  0x11   :  { %408 = vmatmul.mubr.msk.bf16.vlgmr.msra.gmra.mrb[0].mxu0 %vm69_vm1, %v445_v13 }
  0x12   :  { %266 = vmatpush1.bf16.msra.mxu1 %v427_v6 }
  0x13   :  { %267 = vmatprep.subr.bf16.mxu1 %v446_v0 }
  0x16   :  { %268 = vmatpush1.bf16.msra.mxu1 %v428_v9 }
  0x17   :  { %269 = vmatprep.subr.bf16.mxu1 %v446_v0 }
  0x1a   :  { %270 = vmatpush1.bf16.msra.mxu1 %v429_v12 }
  0x1b   :  { %271 = vmatprep.subr.bf16.mxu1 %v446_v0 }
  0x1e   :  { %272 = vmatpush1.bf16.msra.mxu1 %v430_v14 }
  0x1f   :  { %273 = vmatprep.subr.bf16.mxu1 %v446_v0 }
  0x22   :  { %274 = vmatpush1.bf16.msra.mxu1 %v431_v15 }
  0x23   :  { %275 = vmatprep.subr.bf16.mxu1 %v446_v0 }
  0x26   :  { %276 = vmatpush1.bf16.msra.mxu1 %v432_v16 }
  0x27   :  { %277 = vmatprep.subr.bf16.mxu1 %v446_v0 }
  0x2a   :  { %278 = vmatpush1.bf16.msra.mxu1 %v433_v17 }
  0x2b   :  { %279 = vmatprep.subr.bf16.mxu1 %v446_v0 }
  0x2e   :  { %280 = vmatpush1.bf16.msra.mxu1 %v434_v18 }
  0x31   :  { %290 = vmatmul.mubr.bf16.vlgmr.msra.gmra.mrb[0].mxu1 %v435_v19 }
  0x32   :  { %376 = vmatprep.mubr.msk.bf16.mxu1 %vm250_vm0, %v438_v20 }
  0x39   :  { %298 = vmatmul.mubr.bf16.gmra.mrb[4].mxu1 %v440_v21 }
  0xe4   :  { %v409_v22 = vpop.f32.mrb[0].mxu0 }
  0xe5   :  { %v110_v23 = vpop.f32.mrb[1].mxu0  ;;  %v119_v51 = vadd.f32 %v409_v22, %v350_v41 }
  0xe6   :  { %v410_v24 = vpop.f32.mrb[2].mxu0  ;;  %v111_v42 = vadd.f32 %v350_v41, %v110_v23 }
  0xe7   :  { %v113_v25 = vpop.f32.mrb[3].mxu0  ;;  %v122_v52 = vadd.f32 %v410_v24, %v350_v41 }
  0xe8   :  { %v114_v43 = vadd.f32 %v350_v41, %v113_v25 }
 0x104   :  { %v291_v27 = vpop.f32.mrb[0].mxu1 }
 0x105   :  { %v293_v28 = vpop.f32.mrb[1].mxu1  ;;  %v292_v30 = vadd.f32 %v358_v26, %v291_v27 }
 0x106   :  { %v294_v29 = vpop.f32.mrb[2].mxu1 }
 0x107   :  { %v295_v31 = vadd.f32 %v358_v26, %v294_v29  ;;  %v296_v32 = vpop.f32.mrb[3].mxu1 }
 0x109   :  { %v413_v33 = vpack.i.bf16 %v295_v31, %v292_v30 }
 0x10b   :  { %414 = vrot.lane.b32.xlu0 %v413_v33, %s447_s14 }
 0x10c   :  { %v299_v34 = vpop.f32.mrb[4].mxu1 }
 0x10d   :  { %v301_v35 = vpop.f32.mrb[5].mxu1  ;;  %v300_v37 = vadd.f32 %v358_v26, %v299_v34 }
 0x10e   :  { %v302_v36 = vpop.f32.mrb[6].mxu1 }
 0x10f   :  { %v303_v38 = vadd.f32 %v358_v26, %v302_v36  ;;  %v304_v39 = vpop.f32.mrb[7].mxu1 }
 0x111   :  { %v418_v40 = vpack.i.bf16 %v303_v38, %v300_v37 }
 0x113   :  { %419 = vrot.lane.b32.xlu0 %v418_v40, %s447_s14 }
 0x17d   :  { %v415_v44 = vpop.permute.xlu0 %414 }
 0x17e   :  { %v417_v45 = vunpack.i.h.bf16 %v415_v44  ;;  %v416_v46 = vunpack.i.l.bf16 %v415_v44 }
 0x180   :  { %v322_v47 = vsel %vm250_vm0, %v111_v42, %v416_v46  ;;  %v323_v48 = vsel %vm250_vm0, %v114_v43, %v417_v45 }
 0x181   :  { %v388_v49 = vpack.c.bf16 %v323_v48, %v322_v47 }
 0x183   :  { %389 = vst [vmem:[%s572_s6] sm:$0xff] %v388_v49  }
 0x185   :  { %v420_v50 = vpop.permute.xlu0 %419 }
 0x186   :  { %v422_v53 = vunpack.i.h.bf16 %v420_v50  ;;  %v421_v54 = vunpack.i.l.bf16 %v420_v50 }
 0x188   :  { %v324_v55 = vsel %vm250_vm0, %v119_v51, %v421_v54  ;;  %v325_v56 = vsel %vm250_vm0, %v122_v52, %v422_v53 }
 0x189   :  { %v393_v57 = vpack.c.bf16 %v325_v56, %v324_v55 }
 0x18b   :  { %395 = vst [vmem:[%s572_s6 + $0x8] sm:$0xff] %v393_v57  }

// kernel: crossformer_segmentation_forward.4
= control target key start
LH: loop header
LB: loop body
LE: loop exit
PB: predicated region body
PF: predicated region fallthrough
CT: control target
= control target key end

     0   :  { %s1642_s24 = smov 0   ;;  %s1892_s0 = inlined_call_operand.vmem [shape: bf16[2,16,128], index: 0, kind: input, shape index: {}]   ;;  %s1893_s1 = inlined_call_operand.vmem [shape: f32[1,128], index: 1, kind: input, shape index: {}]   ;;  %s1894_s2 = inlined_call_operand.vmem [shape: f32[1,128], index: 2, kind: input, shape index: {}]   ;;  %s1895_s3 = inlined_call_operand.vmem [shape: bf16[128,384], index: 3, kind: input, shape index: {}]   ;;  %s1896_s4 = inlined_call_operand.vmem [shape: f32[1,384], index: 4, kind: input, shape index: {}]   ;;  %s1897_s5 = inlined_call_operand.vmem [shape: bf16[128,128], index: 5, kind: input, shape index: {}]   ;;  %s1898_s6 = inlined_call_operand.vmem [shape: f32[1,128], index: 6, kind: input, shape index: {}]   ;;  %s1899_s7 = inlined_call_operand.vmem [shape: bf16[2,16,128], index: 7, kind: output, shape index: {}]  }
   0x1 LB: > { %s1292_s25 = sadd.s32 4294967295, %s1594_s24   ;;  %p1296_p0 = scmp.ge.s32.totalorder %s1594_s24, 1  ;;  %s1594_s24 = sphi %s1642_s24, %s17_s24  }
   0x2   : > { %p237_p1 = scmp.lt.s32.totalorder %s1594_s24, 3 }
   0x4   : > { %p238_p2 = pnand %p1296_p0, %p237_p1 }
   0x5   : > { %p269_p3 = scmp.lt.s32.totalorder (!%p238_p2), %s1292_s25, 1  ;;  %v1512_v3 = vld [vmem:[%s1895_s3 + $0x4] ss:$12 sps:$4 sm:$0xff] (!%p238_p2)   ;;  %v1514_v4 = vld [vmem:[%s1895_s3] ss:$12 sps:$4 sm:$0xff] (!%p238_p2)   ;;  %v1596_v5 = vmov (!%p238_p2), 0.0   ;;  %v360_v54 = vlaneseq (!%p238_p2) }
   0x6   : > { %241 = sbr.rel (%p238_p2) target bundleno = 2223 (0x8af), region = 48  ;;  %1395 = vmatprep.subr.bf16.mxu1 (!%p238_p2), %v1596_v5  ;;  %v1515_v6 = vld [vmem:[%s1895_s3 + $0x8] ss:$12 sps:$4 sm:$0xff] (!%p238_p2)   ;;  %503 = vmatprep.subr.bf16.mxu0 (!%p238_p2), %v1512_v3  ;;  %v1518_v16 = vld [vmem:[%s1895_s3 + $0x18] ss:$12 sps:$4 sm:$0xff] (!%p238_p2)   ;;  %v1597_v31 = vmov (!%p238_p2), 0  }
   0x7   : > { %v1516_v7 = vld [vmem:[%s1895_s3 + $0x1c] ss:$12 sps:$4 sm:$0xff] (!%p238_p2)   ;;  %504 = vmatpush1.bf16.msra.mxu0 (!%p238_p2), %v1514_v4  ;;  %1396 = vmatpush3.bf16.msra.mxu1 (!%p238_p2), %v1515_v6  ;;  %v1519_v17 = vld [vmem:[%s1895_s3 + $0x20] ss:$12 sps:$4 sm:$0xff] (!%p238_p2)   ;;  %v1523_v20 = vld [vmem:[%s1895_s3 + $0x38] ss:$12 sps:$4 sm:$0xff] (!%p238_p2)  }
   0x8   : > { %505 = vmatprep.subr.bf16.mxu0 (!%p238_p2), %v1516_v7  ;;  %1397 = vmatprep.subr.bf16.mxu1 (!%p238_p2), %v1596_v5  ;;  %v1520_v18 = vld [vmem:[%s1895_s3 + $0x34] ss:$12 sps:$4 sm:$0xff] (!%p238_p2)   ;;  %v1522_v19 = vld [vmem:[%s1895_s3 + $0x30] ss:$12 sps:$4 sm:$0xff] (!%p238_p2)   ;;  %v1524_v21 = vld [vmem:[%s1895_s3 + $0x4c] ss:$12 sps:$4 sm:$0xff] (!%p238_p2)  }
   0x9   : > { %v1526_v22 = vld [vmem:[%s1895_s3 + $0x48] ss:$12 sps:$4 sm:$0xff] (!%p238_p2)   ;;  %v1527_v23 = vld [vmem:[%s1895_s3 + $0x50] ss:$12 sps:$4 sm:$0xff] (!%p238_p2)   ;;  %v1530_v25 = vld [vmem:[%s1895_s3 + $0x60] ss:$12 sps:$4 sm:$0xff] (!%p238_p2)   ;;  %535 = vmatprep.mubr.bf16.mxu0 (!%p238_p2), %v1597_v31 }
   0xa   : > { %v1528_v24 = vld [vmem:[%s1895_s3 + $0x64] ss:$12 sps:$4 sm:$0xff] (!%p238_p2)   ;;  %v1531_v26 = vld [vmem:[%s1895_s3 + $0x68] ss:$12 sps:$4 sm:$0xff] (!%p238_p2)   ;;  %v1535_v29 = vld [vmem:[%s1895_s3 + $0x80] ss:$12 sps:$4 sm:$0xff] (!%p238_p2)  }
   0xb   : > { %506 = vmatpush1.bf16.msra.mxu0 (!%p238_p2), %v1518_v16  ;;  %1398 = vmatpush3.bf16.msra.mxu1 (!%p238_p2), %v1519_v17  ;;  %v1532_v27 = vld [vmem:[%s1895_s3 + $0x7c] ss:$12 sps:$4 sm:$0xff] (!%p238_p2)   ;;  %v1534_v28 = vld [vmem:[%s1895_s3 + $0x78] ss:$12 sps:$4 sm:$0xff] (!%p238_p2)   ;;  %v1536_v30 = vld [vmem:[%s1895_s3 + $0x94] ss:$12 sps:$4 sm:$0xff] (!%p238_p2)  }
   0xc   : > { %1399 = vmatprep.subr.bf16.mxu1 (!%p238_p2), %v1596_v5  ;;  %507 = vmatprep.subr.bf16.mxu0 (!%p238_p2), %v1520_v18  ;;  %vm1598_vm0 = vmmov (!%p238_p2), 0   ;;  %v1538_v32 = vld [vmem:[%s1895_s3 + $0x90] ss:$12 sps:$4 sm:$0xff] (!%p238_p2)   ;;  %v1539_v33 = vld [vmem:[%s1895_s3 + $0x98] ss:$12 sps:$4 sm:$0xff] (!%p238_p2)   ;;  %v361_v55 = vshrl.u32 (!%p238_p2), %v360_v54, 7 }
   0xd   : > { %s1901_s25 = smov (!%p269_p3, %s1292_s25), 1  ;;  %1411 = vmatprep.mubr.msk.bf16.mxu1 %vm1598_vm0, %v1596_v5  ;;  %v1540_v34 = vld [vmem:[%s1895_s3 + $0xac] ss:$12 sps:$4 sm:$0xff]   ;;  %v1542_v35 = vld [vmem:[%s1895_s3 + $0xa8] ss:$12 sps:$4 sm:$0xff]   ;;  %vm589_vm1 = vcmask 261120  }
   0xe   : > { %s1348_s26 = sshll.u32 %s1901_s25, 3  ;;  %v1543_v36 = vld [vmem:[%s1895_s3 + $0xb0] ss:$12 sps:$4 sm:$0xff]   ;;  %v1301_v45 = vld [vmem:[%s1893_s1] ss:$0 sm:$0xff]  ;;  %v362_v56 = vsub.s32 0, %v361_v55 }
   0xf   : > { %s273_s29 = scalar_lea.vmem %s1892_s0, %s1348_s26  ;;  %508 = vmatpush1.bf16.msra.mxu0 %v1522_v19  ;;  %1400 = vmatpush3.bf16.msra.mxu1 %v1523_v20  ;;  %v1302_v49 = vld [vmem:[%s1894_s2] ss:$0 sm:$0xff]  ;;  %v370_v57 = vsub.s32 2, %v361_v55  ;;  %v366_v59 = vsub.s32 1, %v361_v55  ;;  %vm639_vm2 = vcmask 130048   ;;  %s1599_s21 = smov 96  }
  0x10   : > { %v1353_v0 = vld [vmem:[%s273_s29] sm:$0xff]   ;;  %1401 = vmatprep.subr.bf16.mxu1 %v1596_v5  ;;  %509 = vmatprep.subr.bf16.mxu0 %v1524_v21  ;;  %s1600_s22 = smov 64   ;;  %s1601_s23 = smov 32   ;;  %vm1106_vm3 = vcmask 523264   ;;  %vm1109_vm4 = vcmask 785408  }
  0x11   : > { %v1658_v1 = vunpack.c.l.bf16 %v1353_v0  ;;  %v1661_v2 = vunpack.c.h.bf16 %v1353_v0  ;;  %v358_v58 = vld [vmem:[%s1896_s4] sm:$0x7]  ;;  %s278_s27 = scalar_lea.vmem %s1899_s7, %s1348_s26 }
  0x12   : > { %v363_v60 = vrot.slane %v358_v58, %v362_v56  ;;  %v371_v61 = vrot.slane %v358_v58, %v370_v57  ;;  %v367_v0 = vrot.slane %v358_v58, %v366_v59 }
  0x13   : > { %284 = vadd.xlane.f32.xlu0 %v1658_v1  ;;  %510 = vmatpush1.bf16.msra.mxu0 %v1526_v22 }
  0x14   : > { %1402 = vmatpush3.bf16.msra.mxu1 %v1527_v23  ;;  %511 = vmatprep.subr.bf16.mxu0 %v1528_v24 }
  0x15   : > { %1403 = vmatprep.subr.bf16.mxu1 %v1596_v5 }
  0x17   : > { %286 = vadd.xlane.f32.xlu0 %v1661_v2  ;;  %512 = vmatpush1.bf16.msra.mxu0 %v1530_v25 }
  0x18   : > { %1404 = vmatpush3.bf16.msra.mxu1 %v1531_v26  ;;  %513 = vmatprep.subr.bf16.mxu0 %v1532_v27 }
  0x19   : > { %1405 = vmatprep.subr.bf16.mxu1 %v1596_v5 }
  0x1b   : > { %514 = vmatpush1.bf16.msra.mxu0 %v1534_v28 }
  0x1c   : > { %1406 = vmatpush3.bf16.msra.mxu1 %v1535_v29  ;;  %515 = vmatprep.subr.bf16.mxu0 %v1536_v30 }
  0x1d   : > { %1407 = vmatprep.subr.bf16.mxu1 %v1596_v5 }
  0x1f   : > { %516 = vmatpush1.bf16.msra.mxu0 %v1538_v32 }
  0x20   : > { %1408 = vmatpush3.bf16.msra.mxu1 %v1539_v33  ;;  %517 = vmatprep.subr.bf16.mxu0 %v1540_v34 }
  0x21   : > { %1409 = vmatprep.subr.bf16.mxu1 %v1596_v5 }
  0x23   : > { %518 = vmatpush1.bf16.msra.mxu0 %v1542_v35 }
  0x24   : > { %1410 = vmatpush3.bf16.msra.mxu1 %v1543_v36  ;;  %1439 = vmatprep.subr.bf16.mxu0 %v1596_v5 }
  0x25   : > { %1415 = vmatprep.subr.bf16.mxu1 %v1596_v5 }
  0xa0   : > { %v285_v8 = vpop.xlane.xlu0 %284 }
  0xa1   : > { %v289_v9 = vmul.f32 0.0078125, %v285_v8 }
  0xa3   : > { %v1679_v10 = vsub.f32 %v1658_v1, %v289_v9 }
  0xa4   : > { %v287_v11 = vpop.xlane.xlu0 %286 }
  0xa5   : > { %v290_v12 = vmul.f32 0.0078125, %v287_v11  ;;  %v293_v13 = vmul.f32 %v1679_v10, %v1679_v10 }
  0xa7   : > { %v1684_v14 = vsub.f32 %v1661_v2, %v290_v12  ;;  %295 = vadd.xlane.f32.xlu1 %v293_v13 }
  0xa9   : > { %v294_v15 = vmul.f32 %v1684_v14, %v1684_v14 }
  0xab   : > { %297 = vadd.xlane.f32.xlu1 %v294_v15 }
 0x134   : > { %v296_v37 = vpop.xlane.xlu1 %295 }
 0x135   : > { %v299_v38 = vmul.f32 0.0078125, %v296_v37 }
 0x137   : > { %v301_v39 = vadd.f32 1e-05, %v299_v38 }
 0x138   : > { %v298_v40 = vpop.xlane.xlu1 %297 }
 0x139   : > { %1552 = vrsqrt.f32 %v301_v39  ;;  %v300_v41 = vmul.f32 0.0078125, %v298_v40 }
 0x13b   : > { %v302_v42 = vadd.f32 1e-05, %v300_v41 }
 0x13d   : > { %1554 = vrsqrt.f32 %v302_v42 }
 0x143   : > { %v1553_v43 = vpop.eup %1552 }
 0x144   : > { %v305_v44 = vmul.f32 %v1553_v43, %v1679_v10 }
 0x146   : > { %v314_v48 = vmul.f32 %v1301_v45, %v305_v44 }
 0x147   : > { %v1555_v46 = vpop.eup %1554 }
 0x148   : > { %v306_v47 = vmul.f32 %v1555_v46, %v1684_v14  ;;  %v323_v51 = vadd.f32 %v1302_v49, %v314_v48 }
 0x14a   : > { %v315_v50 = vmul.f32 %v1301_v45, %v306_v47 }
 0x14c   : > { %v324_v52 = vadd.f32 %v1302_v49, %v315_v50 }
 0x14e   : > { %v325_v53 = vpack.c.bf16 %v324_v52, %v323_v51 }
 0x150   : > { %536 = vmatmul.mubr.bf16.vlgmr.msra.gmra.mrb[0].mxu0 %v325_v53  ;;  %1412 = vmatmul.mubr.bf16.vlgmr.msra.gmra.mrb[0].mxu1 %v325_v53 }
 0x151   : > { %1417 = vmatprep.mubr.msk.bf16.mxu1 %vm1598_vm0, %v1596_v5  ;;  %1441 = vmatprep.mubr.msk.bf16.mxu0 %vm1598_vm0, %v1596_v5 }
 0x223   : > { %v537_v62 = vpop.f32.mrb[0].mxu0  ;;  %v580_v63 = vpop.f32.mrb[0].mxu1 }
 0x224   : > { %v539_v3 = vpop.f32.mrb[1].mxu0  ;;  %v1413_v4 = vpop.f32.mrb[1].mxu1  ;;  %v538_v8 = vadd.f32 %v537_v62, %v363_v60  ;;  %v581_v9 = vadd.f32 %v580_v63, %v371_v61 }
 0x225   : > { %v541_v6 = vpop.f32.mrb[2].mxu0  ;;  %v583_v7 = vpop.f32.mrb[2].mxu1  ;;  %v540_v14 = vadd.f32 %v539_v3, %v367_v0 }
 0x226   : > { %v542_v10 = vadd.f32 %v541_v6, %v363_v60  ;;  %v584_v11 = vadd.f32 %v583_v7, %v371_v61  ;;  %v543_v12 = vpop.f32.mrb[3].mxu0  ;;  %v1414_v13 = vpop.f32.mrb[3].mxu1 }
 0x227   : > { %v544_v15 = vadd.f32 %v543_v12, %v367_v0 }
 0x228   : > { %v587_v16 = vpack.c.bf16 %v542_v10, %v538_v8  ;;  %v1773_v17 = vpack.c.bf16 %v584_v11, %v581_v9 }
 0x229   : > { %v588_v18 = vpack.c.bf16 %v544_v15, %v540_v14 }
 0x22b   : > { %v594_v19 = vsel %vm589_vm1, %v588_v18, 0 }
 0x22c   : > { %1416 = vmatpush3.bf16.xpose.msra.mxu1 %v594_v19 }
 0x22d   : > { %1421 = vmatprep.subr.bf16.mxu1 %v1596_v5 }
 0x233   : > { %1418 = vmatmul.mubr.msk.bf16.vlgmr.msra.gmra.mrb[4].mxu1 %vm589_vm1, %v587_v16 }
 0x234   : > { %1422 = vmatpush3.bf16.msra.mxu1 %v1773_v17  ;;  %1423 = vmatprep.mubr.msk.bf16.mxu1 %vm1598_vm0, %v1596_v5 }
 0x235   : > { %1427 = vmatprep.subr.bf16.mxu1 %v1596_v5 }
 0x306   : > { %v630_v20 = vpop.f32.mrb[4].mxu1 }
 0x307   : > { %v637_v21 = vmul.f32 0.17677669, %v630_v20  ;;  %v1419_v22 = vpop.f32.mrb[5].mxu1 }
 0x308   : > { %v633_v23 = vpop.f32.mrb[6].mxu1 }
 0x309   : > { %v638_v24 = vmul.f32 0.17677669, %v633_v23  ;;  %v1420_v25 = vpop.f32.mrb[7].mxu1  ;;  %v640_v26 = vsel %vm639_vm2, %v637_v21, -inf }
 0x30a   : > { %641 = vmax.xlane.f32.xlu0 %v640_v26 }
 0x30b   : > { %v643_v27 = vsel %vm639_vm2, %v638_v24, -inf }
 0x30c   : > { %644 = vmax.xlane.f32.xlu1 %v643_v27 }
 0x397   : > { %v642_v28 = vpop.xlane.xlu0 %641 }
 0x398   : > { %v646_v29 = vsub.f32 %v637_v21, %v642_v28 }
 0x399   : > { %v645_v30 = vpop.xlane.xlu1 %644 }
 0x39a   : > { %v648_v31 = vmul.f32 1.442695, %v646_v29  ;;  %v647_v32 = vsub.f32 %v638_v24, %v645_v30 }
 0x39c   : > { %1556 = vpow2.f32 %v648_v31  ;;  %v650_v33 = vmul.f32 1.442695, %v647_v32 }
 0x39e   : > { %1558 = vpow2.f32 %v650_v33 }
 0x3a6   : > { %v1557_v34 = vpop.eup %1556 }
 0x3a7   : > { %v652_v35 = vsel %vm639_vm2, %v1557_v34, 0.0 }
 0x3a8   : > { %v1559_v36 = vpop.eup %1558  ;;  %653 = vadd.xlane.f32.xlu0 %v652_v35 }
 0x3a9   : > { %v655_v37 = vsel %vm639_vm2, %v1559_v36, 0.0 }
 0x3aa   : > { %656 = vadd.xlane.f32.xlu1 %v655_v37 }
 0x3bb   : > { %709 = vrot.lane.b32.xlu1 %v587_v16, %s1599_s21 }
 0x3be   : > { %712 = vrot.lane.b32.xlu0 %v588_v18, %s1599_s21 }
 0x3bf   : > { %836 = vrot.lane.b32.xlu1 %v588_v18, %s1600_s22 }
 0x3c2   : > { %959 = vrot.lane.b32.xlu0 %v588_v18, %s1601_s23 }
 0x3c3   : > { %834 = vrot.lane.b32.xlu1 %v587_v16, %s1600_s22 }
 0x3c7   : > { %957 = vrot.lane.b32.xlu1 %v587_v16, %s1601_s23 }
 0x435   : > { %v654_v38 = vpop.xlane.xlu0 %653 }
 0x436   : > { %1560 = vrcp.f32 %v654_v38 }
 0x437   : > { %v657_v39 = vpop.xlane.xlu1 %656 }
 0x438   : > { %1562 = vrcp.f32 %v657_v39 }
 0x439   : > { %v713_v41 = vpop.permute.xlu0 %712 }
 0x43a   : > { %v718_v50 = vsel %vm589_vm1, %v713_v41, 0 }
 0x43b   : > { %v710_v40 = vpop.permute.xlu1 %709 }
 0x43d   : > { %v960_v48 = vpop.permute.xlu0 %959 }
 0x43e   : > { %v965_v52 = vsel %vm589_vm1, %v960_v48, 0 }
 0x43f   : > { %v837_v42 = vpop.permute.xlu1 %836 }
 0x440   : > { %v1561_v43 = vpop.eup %1560  ;;  %v842_v44 = vsel %vm589_vm1, %v837_v42, 0 }
 0x441   : > { %1440 = vmatpush3.bf16.xpose.msra.mxu0 %v842_v44  ;;  %v660_v46 = vmul.f32 %v1561_v43, %v1557_v34 }
 0x442   : > { %v1563_v45 = vpop.eup %1562  ;;  %1451 = vmatprep.subr.bf16.mxu0 %v1596_v5 }
 0x443   : > { %v661_v47 = vmul.f32 %v1563_v45, %v1559_v36  ;;  %v835_v51 = vpop.permute.xlu1 %834 }
 0x445   : > { %v662_v49 = vpack.c.bf16 %v661_v47, %v660_v46 }
 0x447   : > { %1424 = vmatmul.mubr.msk.bf16.vlgmr.msra.gmra.mrb[8].mxu1 %vm639_vm2, %v662_v49  ;;  %v958_v53 = vpop.permute.xlu1 %957 }
 0x448   : > { %1428 = vmatpush3.bf16.xpose.msra.mxu1 %v718_v50  ;;  %1442 = vmatmul.mubr.msk.bf16.vlgmr.msra.gmra.mrb[4].mxu0 %vm589_vm1, %v835_v51 }
 0x449   : > { %1452 = vmatpush3.bf16.xpose.msra.mxu0 %v965_v52  ;;  %1429 = vmatprep.mubr.msk.bf16.mxu1 %vm1598_vm0, %v1596_v5 }
 0x44a   : > { %1453 = vmatprep.mubr.msk.bf16.mxu0 %vm1598_vm0, %v1596_v5  ;;  %1433 = vmatprep.subr.bf16.mxu1 %v1596_v5 }
 0x44b   : > { %1463 = vmatprep.subr.bf16.mxu0 %v1596_v5 }
 0x44f   : > { %1430 = vmatmul.mubr.msk.bf16.vlgmr.msra.gmra.mrb[12].mxu1 %vm589_vm1, %v710_v40 }
 0x450   : > { %1454 = vmatmul.mubr.msk.bf16.vlgmr.msra.gmra.mrb[8].mxu0 %vm589_vm1, %v958_v53  ;;  %1435 = vmatprep.mubr.msk.bf16.mxu1 %vm1598_vm0, %v1596_v5 }
 0x451   : > { %1479 = vmatprep.mubr.msk.bf16.mxu0 %vm1598_vm0, %v1596_v5 }
 0x51a   : > { %v1810_v54 = vpop.f32.mrb[8].mxu1 }
 0x51b   : > { %v1425_v55 = vpop.f32.mrb[9].mxu1  ;;  %v878_v56 = vpop.f32.mrb[4].mxu0 }
 0x51c   : > { %v1812_v57 = vpop.f32.mrb[10].mxu1  ;;  %v1443_v58 = vpop.f32.mrb[5].mxu0  ;;  %v885_v4 = vmul.f32 0.17677669, %v878_v56 }
 0x51d   : > { %v1426_v59 = vpop.f32.mrb[11].mxu1  ;;  %v881_v60 = vpop.f32.mrb[6].mxu0 }
 0x51e   : > { %v1444_v61 = vpop.f32.mrb[7].mxu0  ;;  %v886_v15 = vmul.f32 0.17677669, %v881_v60  ;;  %v887_v16 = vsel %vm639_vm2, %v885_v4, -inf }
 0x520   : > { %v890_v20 = vsel %vm639_vm2, %v886_v15, -inf }
 0x522   : > { %v754_v62 = vpop.f32.mrb[12].mxu1 }
 0x523   : > { %v761_v63 = vmul.f32 0.17677669, %v754_v62  ;;  %v1431_v0 = vpop.f32.mrb[13].mxu1  ;;  %v1001_v3 = vpop.f32.mrb[8].mxu0 }
 0x524   : > { %v757_v6 = vpop.f32.mrb[14].mxu1  ;;  %v1455_v7 = vpop.f32.mrb[9].mxu0  ;;  %v1008_v19 = vmul.f32 0.17677669, %v1001_v3 }
 0x525   : > { %v762_v8 = vmul.f32 0.17677669, %v757_v6  ;;  %v1432_v9 = vpop.f32.mrb[15].mxu1  ;;  %v1004_v10 = vpop.f32.mrb[10].mxu0  ;;  %v763_v11 = vsel %vm639_vm2, %v761_v63, -inf }
 0x526   : > { %v1456_v12 = vpop.f32.mrb[11].mxu0  ;;  %764 = vmax.xlane.f32.xlu0 %v763_v11  ;;  %v1009_v13 = vmul.f32 0.17677669, %v1004_v10  ;;  %v1010_v21 = vsel %vm639_vm2, %v1008_v19, -inf }
 0x527   : > { %v766_v14 = vsel %vm639_vm2, %v762_v8, -inf }
 0x528   : > { %767 = vmax.xlane.f32.xlu1 %v766_v14  ;;  %v1013_v18 = vsel %vm639_vm2, %v1009_v13, -inf }
 0x52a   : > { %888 = vmax.xlane.f32.xlu0 %v887_v16  ;;  %v1544_v16 = vld [vmem:[%s1897_s5] sm:$0xff]  }
 0x52b   : > { %1464 = vmatpush3.bf16.msra.mxu0 %v1544_v16 }
 0x52c   : > { %1014 = vmax.xlane.f32.xlu1 %v1013_v18  ;;  %v1545_v18 = vld [vmem:[%s1897_s5 + $0x8] sm:$0xff]   ;;  %1465 = vmatprep.subr.bf16.mxu0 %v1596_v5 }
 0x52e   : > { %891 = vmax.xlane.f32.xlu0 %v890_v20  ;;  %v1547_v20 = vld [vmem:[%s1897_s5 + $0x18] sm:$0xff]  }
 0x52f   : > { %1466 = vmatpush3.bf16.msra.mxu0 %v1545_v18 }
 0x530   : > { %1467 = vmatprep.subr.bf16.mxu0 %v1596_v5 }
 0x532   : > { %1011 = vmax.xlane.f32.xlu0 %v1010_v21  ;;  %v1548_v21 = vld [vmem:[%s1897_s5 + $0x20] sm:$0xff]  }
 0x5b3   : > { %v765_v22 = vpop.xlane.xlu0 %764 }
 0x5b4   : > { %v769_v31 = vsub.f32 %v761_v63, %v765_v22 }
 0x5b5   : > { %v768_v23 = vpop.xlane.xlu1 %767 }
 0x5b6   : > { %v770_v32 = vsub.f32 %v762_v8, %v768_v23  ;;  %v771_v37 = vmul.f32 1.442695, %v769_v31  ;;  %v1551_v31 = vld [vmem:[%s1897_s5 + $0x38] sm:$0xff]  }
 0x5b7   : > { %v889_v24 = vpop.xlane.xlu0 %888 }
 0x5b8   : > { %v893_v25 = vsub.f32 %v885_v4, %v889_v24  ;;  %v773_v38 = vmul.f32 1.442695, %v770_v32  ;;  %v1549_v24 = vld [vmem:[%s1897_s5 + $0x28] sm:$0xff]  }
 0x5b9   : > { %v1015_v26 = vpop.xlane.xlu1 %1014 }
 0x5ba   : > { %v895_v27 = vmul.f32 1.442695, %v893_v25  ;;  %v1017_v28 = vsub.f32 %v1009_v13, %v1015_v26 }
 0x5bb   : > { %v892_v29 = vpop.xlane.xlu0 %891 }
 0x5bc   : > { %1564 = vpow2.f32 %v895_v27  ;;  %v894_v30 = vsub.f32 %v886_v15, %v892_v29  ;;  %v1020_v33 = vmul.f32 1.442695, %v1017_v28  ;;  %v1550_v28 = vld [vmem:[%s1897_s5 + $0x30] sm:$0xff]  }
 0x5be   : > { %v897_v34 = vmul.f32 1.442695, %v894_v30 }
 0x5bf   : > { %v1012_v35 = vpop.xlane.xlu0 %1011 }
 0x5c0   : > { %1566 = vpow2.f32 %v897_v34  ;;  %v1016_v36 = vsub.f32 %v1008_v19, %v1012_v35  ;;  %v1546_v19 = vld [vmem:[%s1897_s5 + $0x10] sm:$0xff]  }
 0x5c1   : > { %1568 = vpow2.f32 %v1020_v33  ;;  %1468 = vmatpush3.bf16.msra.mxu0 %v1546_v19 }
 0x5c2   : > { %v1018_v39 = vmul.f32 1.442695, %v1016_v36  ;;  %1469 = vmatprep.subr.bf16.mxu0 %v1596_v5 }
 0x5c4   : > { %1570 = vpow2.f32 %v1018_v39 }
 0x5c5   : > { %1572 = vpow2.f32 %v771_v37  ;;  %1470 = vmatpush3.bf16.msra.mxu0 %v1547_v20 }
 0x5c6   : > { %v1565_v40 = vpop.eup %1564  ;;  %1574 = vpow2.f32 %v773_v38  ;;  %1471 = vmatprep.subr.bf16.mxu0 %v1596_v5 }
 0x5c7   : > { %v899_v41 = vsel %vm639_vm2, %v1565_v40, 0.0 }
 0x5c8   : > { %900 = vadd.xlane.f32.xlu0 %v899_v41 }
 0x5c9   : > { %1472 = vmatpush3.bf16.msra.mxu0 %v1548_v21 }
 0x5ca   : > { %v1567_v42 = vpop.eup %1566  ;;  %1473 = vmatprep.subr.bf16.mxu0 %v1596_v5 }
 0x5cb   : > { %v902_v43 = vsel %vm639_vm2, %v1567_v42, 0.0  ;;  %v1569_v44 = vpop.eup %1568 }
 0x5cc   : > { %903 = vadd.xlane.f32.xlu1 %v902_v43  ;;  %v1025_v48 = vsel %vm639_vm2, %v1569_v44, 0.0 }
 0x5cd   : > { %1474 = vmatpush3.bf16.msra.mxu0 %v1549_v24 }
 0x5ce   : > { %v1571_v45 = vpop.eup %1570  ;;  %1475 = vmatprep.subr.bf16.mxu0 %v1596_v5 }
 0x5cf   : > { %v1573_v46 = vpop.eup %1572  ;;  %v1022_v47 = vsel %vm639_vm2, %v1571_v45, 0.0 }
 0x5d0   : > { %v1575_v49 = vpop.eup %1574  ;;  %1023 = vadd.xlane.f32.xlu0 %v1022_v47  ;;  %1026 = vadd.xlane.f32.xlu1 %v1025_v48  ;;  %v775_v50 = vsel %vm639_vm2, %v1573_v46, 0.0 }
 0x5d1   : > { %v778_v51 = vsel %vm639_vm2, %v1575_v49, 0.0  ;;  %1476 = vmatpush3.bf16.msra.mxu0 %v1550_v28 }
 0x5d2   : > { %1477 = vmatprep.subr.bf16.mxu0 %v1596_v5 }
 0x5d4   : > { %776 = vadd.xlane.f32.xlu0 %v775_v50  ;;  %779 = vadd.xlane.f32.xlu1 %v778_v51 }
 0x5d5   : > { %1478 = vmatpush3.bf16.msra.mxu0 %v1551_v31 }
 0x5e5   : > { %910 = vrot.lane.b32.xlu1 %v1773_v17, %s1600_s22 }
 0x5e9   : > { %1033 = vrot.lane.b32.xlu1 %v1773_v17, %s1601_s23 }
 0x5ea   : > { %787 = vrot.lane.b32.xlu0 %v1773_v17, %s1599_s21 }
 0x655   : > { %v901_v52 = vpop.xlane.xlu0 %900 }
 0x659   : > { %v904_v53 = vpop.xlane.xlu1 %903 }
 0x65d   : > { %v1024_v55 = vpop.xlane.xlu0 %1023  ;;  %v1027_v56 = vpop.xlane.xlu1 %1026 }
 0x661   : > { %v777_v58 = vpop.xlane.xlu0 %776  ;;  %v780_v59 = vpop.xlane.xlu1 %779 }
 0x662   : > { %1576 = vrcp.f32 %v777_v58 }
 0x663   : > { %1578 = vrcp.f32 %v780_v59 }
 0x664   : > { %1580 = vrcp.f32 %v904_v53 }
 0x665   : > { %v788_v60 = vpop.permute.xlu0 %787  ;;  %1582 = vrcp.f32 %v901_v52  ;;  %v911_v4 = vpop.permute.xlu1 %910 }
 0x666   : > { %1434 = vmatpush3.bf16.msra.mxu1 %v788_v60  ;;  %1584 = vrcp.f32 %v1024_v55 }
 0x667   : > { %1445 = vmatprep.subr.bf16.mxu1 %v1596_v5  ;;  %1586 = vrcp.f32 %v1027_v56  ;;  %v1335_v56 = vld [vmem:[%s1898_s6] ss:$0 sm:$0xff] }
 0x669   : > { %v1034_v12 = vpop.permute.xlu1 %1033 }
 0x66c   : > { %v1577_v61 = vpop.eup %1576 }
 0x66d   : > { %v1579_v62 = vpop.eup %1578  ;;  %v783_v63 = vmul.f32 %v1577_v61, %v1573_v46 }
 0x66e   : > { %v784_v0 = vmul.f32 %v1579_v62, %v1575_v49  ;;  %v1581_v3 = vpop.eup %1580 }
 0x66f   : > { %v1583_v6 = vpop.eup %1582  ;;  %v908_v7 = vmul.f32 %v1581_v3, %v1567_v42 }
 0x670   : > { %v785_v17 = vpack.c.bf16 %v784_v0, %v783_v63  ;;  %v907_v8 = vmul.f32 %v1583_v6, %v1565_v40  ;;  %v1585_v9 = vpop.eup %1584 }
 0x671   : > { %v1587_v11 = vpop.eup %1586  ;;  %v1030_v13 = vmul.f32 %v1585_v9, %v1571_v45 }
 0x672   : > { %1436 = vmatmul.mubr.msk.bf16.vlgmr.msra.gmra.mrb[16].mxu1 %vm639_vm2, %v785_v17  ;;  %v909_v10 = vpack.c.bf16 %v908_v7, %v907_v8  ;;  %v1031_v14 = vmul.f32 %v1587_v11, %v1569_v44 }
 0x673   : > { %1446 = vmatpush3.bf16.msra.mxu1 %v911_v4  ;;  %1447 = vmatprep.mubr.msk.bf16.mxu1 %vm1598_vm0, %v1596_v5 }
 0x674   : > { %1457 = vmatprep.subr.bf16.mxu1 %v1596_v5  ;;  %v1032_v15 = vpack.c.bf16 %v1031_v14, %v1030_v13 }
 0x67a   : > { %1448 = vmatmul.mubr.msk.bf16.vlgmr.msra.gmra.mrb[20].mxu1 %vm639_vm2, %v909_v10 }
 0x67b   : > { %1458 = vmatpush3.bf16.msra.mxu1 %v1034_v12  ;;  %1459 = vmatprep.mubr.msk.bf16.mxu1 %vm1598_vm0, %v1596_v5 }
 0x682   : > { %1460 = vmatmul.mubr.msk.bf16.vlgmr.msra.gmra.mrb[24].mxu1 %vm639_vm2, %v1032_v15 }
 0x745   : > { %v827_v22 = vpop.f32.mrb[16].mxu1 }
 0x746   : > { %v1437_v23 = vpop.f32.mrb[17].mxu1 }
 0x747   : > { %v830_v25 = vpop.f32.mrb[18].mxu1 }
 0x748   : > { %v1497_v26 = vpack.i.bf16 %v830_v25, %v827_v22  ;;  %v1438_v27 = vpop.f32.mrb[19].mxu1 }
 0x74a   : > { %1498 = vrot.lane.b32.xlu1 %v1497_v26, %s1601_s23 }
 0x74d   : > { %v950_v29 = vpop.f32.mrb[20].mxu1 }
 0x74e   : > { %v1449_v30 = vpop.f32.mrb[21].mxu1 }
 0x74f   : > { %v953_v32 = vpop.f32.mrb[22].mxu1 }
 0x750   : > { %v1502_v33 = vpack.i.bf16 %v953_v32, %v950_v29  ;;  %v1450_v34 = vpop.f32.mrb[23].mxu1 }
 0x752   : > { %1503 = vrot.lane.b32.xlu0 %v1502_v33, %s1600_s22 }
 0x755   : > { %v1073_v35 = vpop.f32.mrb[24].mxu1 }
 0x756   : > { %v1461_v36 = vpop.f32.mrb[25].mxu1 }
 0x757   : > { %v1076_v37 = vpop.f32.mrb[26].mxu1 }
 0x758   : > { %v1507_v38 = vpack.i.bf16 %v1076_v37, %v1073_v35  ;;  %v1462_v39 = vpop.f32.mrb[27].mxu1 }
 0x75a   : > { %1508 = vrot.lane.b32.xlu1 %v1507_v38, %s1599_s21 }
 0x7bc   : > { %v1499_v40 = vpop.permute.xlu1 %1498 }
 0x7bd   : > { %v1501_v41 = vunpack.i.h.bf16 %v1499_v40  ;;  %v1500_v42 = vunpack.i.l.bf16 %v1499_v40 }
 0x7bf   : > { %v1105_v46 = vsel %vm589_vm1, %v1812_v57, %v1501_v41  ;;  %v1104_v47 = vsel %vm589_vm1, %v1810_v54, %v1500_v42 }
 0x7c4   : > { %v1504_v5 = vpop.permute.xlu0 %1503 }
 0x7c5   : > { %v1506_v43 = vunpack.i.h.bf16 %v1504_v5  ;;  %v1505_v44 = vunpack.i.l.bf16 %v1504_v5 }
 0x7c7   : > { %v1108_v50 = vsel %vm1106_vm3, %v1105_v46, %v1506_v43  ;;  %v1107_v51 = vsel %vm1106_vm3, %v1104_v47, %v1505_v44 }
 0x7cc   : > { %v1509_v45 = vpop.permute.xlu1 %1508 }
 0x7cd   : > { %v1511_v48 = vunpack.i.h.bf16 %v1509_v45  ;;  %v1510_v49 = vunpack.i.l.bf16 %v1509_v45 }
 0x7cf   : > { %v1111_v52 = vsel %vm1109_vm4, %v1108_v50, %v1511_v48  ;;  %v1110_v53 = vsel %vm1109_vm4, %v1107_v51, %v1510_v49 }
 0x7d0   : > { %v1112_v55 = vpack.c.bf16 %v1111_v52, %v1110_v53 }
 0x7d2   : > { %1480 = vmatmul.mubr.bf16.vlgmr.msra.gmra.mrb[12].mxu0 %v1112_v55 }
 0x8a5   : > { %v1218_v58 = vpop.f32.mrb[12].mxu0 }
 0x8a6   : > { %v1219_v59 = vadd.f32 %v1335_v56, %v1218_v58  ;;  %v1481_v60 = vpop.f32.mrb[13].mxu0 }
 0x8a7   : > { %v1221_v57 = vpop.f32.mrb[14].mxu0 }
 0x8a8   : > { %v1222_v61 = vadd.f32 %v1335_v56, %v1221_v57  ;;  %v1482_v62 = vpop.f32.mrb[15].mxu0  ;;  %v1225_v54 = vadd.f32 %v1658_v1, %v1219_v59 }
 0x8aa   : > { %v1226_v63 = vadd.f32 %v1661_v2, %v1222_v61 }
 0x8ac   : > { %v1359_v0 = vpack.c.bf16 %v1226_v63, %v1225_v54 }
 0x8ae   : > { %1360 = vst [vmem:[%s278_s27] sm:$0xff] %v1359_v0  }
 0x8af PF: > { %s17_s24 = sadd.s32 1, %s1594_s24  }
 0x8b0   : > { %p14_p4 = scmp.ge.s32.totalorder %s17_s24, 4  }
 0x8b2   :  { %16 = sbr.rel (!%p14_p4) target bundleno = 1 (0x1), region = 78 }

// kernel: crossformer_segmentation_forward.5
= control target key start
LH: loop header
LB: loop body
LE: loop exit
PB: predicated region body
PF: predicated region fallthrough
CT: control target
= control target key end

     0   :  { %v1377_v52 = vmov 0   ;;  %s1857_s0 = inlined_call_operand.vmem [shape: bf16[32,128], index: 0, kind: input, shape index: {}]   ;;  %s1858_s3 = inlined_call_operand.vmem [shape: bf16[128,512], index: 3, kind: input, shape index: {}]   ;;  %s1859_s1 = inlined_call_operand.vmem [shape: f32[1,128], index: 1, kind: input, shape index: {}]   ;;  %s1860_s2 = inlined_call_operand.vmem [shape: f32[1,128], index: 2, kind: input, shape index: {}]   ;;  %s1861_s5 = inlined_call_operand.vmem [shape: bf16[512,128], index: 5, kind: input, shape index: {}]   ;;  %s1862_s7 = inlined_call_operand.vmem [shape: bf16[128,128], index: 7, kind: input, shape index: {}]   ;;  %s1863_s4 = inlined_call_operand.vmem [shape: f32[1,512], index: 4, kind: input, shape index: {}]   ;;  %s1864_s6 = inlined_call_operand.vmem [shape: f32[1,128], index: 6, kind: input, shape index: {}]   ;;  %s1865_s8 = inlined_call_operand.vmem [shape: f32[1,128], index: 8, kind: input, shape index: {}]   ;;  %s1866_s9 = inlined_call_operand.vmem [shape: f32[32,128], index: 9, kind: output, shape index: {}]  }
   0x1   :  { %v1154_v0 = vld [vmem:[%s1857_s0] sm:$0xff]   ;;  %v1161_v1 = vld [vmem:[%s1857_s0 + $0x8] sm:$0xff]   ;;  %356 = vmatprep.mubr.bf16.mxu0 %v1377_v52  ;;  %409 = vmatprep.mubr.bf16.mxu1 %v1377_v52 }
   0x2   :  { %v1434_v2 = vunpack.c.l.bf16 %v1154_v0  ;;  %v1436_v3 = vunpack.c.l.bf16 %v1161_v1  ;;  %v1440_v4 = vunpack.c.h.bf16 %v1154_v0  ;;  %v1442_v5 = vunpack.c.h.bf16 %v1161_v1  ;;  %v1249_v6 = vld [vmem:[%s1858_s3 + $0x4] ss:$16 sps:$4 sm:$0xff]   ;;  %v1251_v7 = vld [vmem:[%s1858_s3 + $0xc] ss:$16 sps:$4 sm:$0xff]   ;;  %v1253_v8 = vld [vmem:[%s1858_s3] ss:$16 sps:$4 sm:$0xff]  }
   0x3   :  { %324 = vmatprep.subr.bf16.mxu0 %v1249_v6  ;;  %v1254_v9 = vld [vmem:[%s1858_s3 + $0x8] ss:$16 sps:$4 sm:$0xff]   ;;  %377 = vmatprep.subr.bf16.mxu1 %v1251_v7  ;;  %v1255_v10 = vld [vmem:[%s1858_s3 + $0x24] ss:$16 sps:$4 sm:$0xff]   ;;  %v1257_v11 = vld [vmem:[%s1858_s3 + $0x2c] ss:$16 sps:$4 sm:$0xff]  }
   0x4   :  { %41 = vadd.xlane.f32.xlu0 %v1434_v2  ;;  %45 = vadd.xlane.f32.xlu1 %v1436_v3  ;;  %v1259_v28 = vld [vmem:[%s1858_s3 + $0x20] ss:$16 sps:$4 sm:$0xff]   ;;  %v1260_v29 = vld [vmem:[%s1858_s3 + $0x28] ss:$16 sps:$4 sm:$0xff]   ;;  %v1261_v30 = vld [vmem:[%s1858_s3 + $0x44] ss:$16 sps:$4 sm:$0xff]  }
   0x5   :  { %325 = vmatpush1.bf16.msra.mxu0 %v1253_v8  ;;  %378 = vmatpush1.bf16.msra.mxu1 %v1254_v9  ;;  %v1263_v31 = vld [vmem:[%s1858_s3 + $0x4c] ss:$16 sps:$4 sm:$0xff]   ;;  %v1265_v32 = vld [vmem:[%s1858_s3 + $0x40] ss:$16 sps:$4 sm:$0xff]   ;;  %v1266_v33 = vld [vmem:[%s1858_s3 + $0x48] ss:$16 sps:$4 sm:$0xff]  }
   0x6   :  { %326 = vmatprep.subr.bf16.mxu0 %v1255_v10  ;;  %379 = vmatprep.subr.bf16.mxu1 %v1257_v11  ;;  %v1267_v34 = vld [vmem:[%s1858_s3 + $0x64] ss:$16 sps:$4 sm:$0xff]   ;;  %v1269_v35 = vld [vmem:[%s1858_s3 + $0x6c] ss:$16 sps:$4 sm:$0xff]   ;;  %v1271_v36 = vld [vmem:[%s1858_s3 + $0x60] ss:$16 sps:$4 sm:$0xff]  }
   0x7   :  { %v1272_v37 = vld [vmem:[%s1858_s3 + $0x68] ss:$16 sps:$4 sm:$0xff]   ;;  %v1273_v38 = vld [vmem:[%s1858_s3 + $0x84] ss:$16 sps:$4 sm:$0xff]   ;;  %v1275_v39 = vld [vmem:[%s1858_s3 + $0x8c] ss:$16 sps:$4 sm:$0xff]  }
   0x8   :  { %43 = vadd.xlane.f32.xlu0 %v1440_v4  ;;  %47 = vadd.xlane.f32.xlu1 %v1442_v5  ;;  %v1277_v40 = vld [vmem:[%s1858_s3 + $0x80] ss:$16 sps:$4 sm:$0xff]   ;;  %v1278_v41 = vld [vmem:[%s1858_s3 + $0x88] ss:$16 sps:$4 sm:$0xff]   ;;  %v1279_v42 = vld [vmem:[%s1858_s3 + $0xa4] ss:$16 sps:$4 sm:$0xff]  }
   0x9   :  { %327 = vmatpush1.bf16.msra.mxu0 %v1259_v28  ;;  %380 = vmatpush1.bf16.msra.mxu1 %v1260_v29  ;;  %v1281_v43 = vld [vmem:[%s1858_s3 + $0xac] ss:$16 sps:$4 sm:$0xff]   ;;  %v1283_v44 = vld [vmem:[%s1858_s3 + $0xa0] ss:$16 sps:$4 sm:$0xff]   ;;  %v1284_v45 = vld [vmem:[%s1858_s3 + $0xa8] ss:$16 sps:$4 sm:$0xff]  }
   0xa   :  { %328 = vmatprep.subr.bf16.mxu0 %v1261_v30  ;;  %381 = vmatprep.subr.bf16.mxu1 %v1263_v31  ;;  %v1285_v46 = vld [vmem:[%s1858_s3 + $0xc4] ss:$16 sps:$4 sm:$0xff]   ;;  %v1287_v47 = vld [vmem:[%s1858_s3 + $0xcc] ss:$16 sps:$4 sm:$0xff]   ;;  %v1289_v48 = vld [vmem:[%s1858_s3 + $0xc0] ss:$16 sps:$4 sm:$0xff]  }
   0xb   :  { %v1290_v49 = vld [vmem:[%s1858_s3 + $0xc8] ss:$16 sps:$4 sm:$0xff]   ;;  %v1291_v50 = vld [vmem:[%s1858_s3 + $0xe4] ss:$16 sps:$4 sm:$0xff]   ;;  %v1293_v51 = vld [vmem:[%s1858_s3 + $0xec] ss:$16 sps:$4 sm:$0xff]  }
   0xc   :  { %v1295_v53 = vld [vmem:[%s1858_s3 + $0xe0] ss:$16 sps:$4 sm:$0xff]   ;;  %v1296_v54 = vld [vmem:[%s1858_s3 + $0xe8] ss:$16 sps:$4 sm:$0xff]  }
   0xd   :  { %329 = vmatpush1.bf16.msra.mxu0 %v1265_v32  ;;  %382 = vmatpush1.bf16.msra.mxu1 %v1266_v33  ;;  %v1077_v9 = vld [vmem:[%s1859_s1] ss:$0 sm:$0xff]  ;;  %v1301_v31 = vld [vmem:[%s1861_s5 + $0x48] sm:$0xff]  }
   0xe   :  { %330 = vmatprep.subr.bf16.mxu0 %v1267_v34  ;;  %383 = vmatprep.subr.bf16.mxu1 %v1269_v35  ;;  %v1297_v29 = vld [vmem:[%s1861_s5 + $0x40] sm:$0xff]   ;;  %v1302_v32 = vld [vmem:[%s1861_s5 + $0xc8] sm:$0xff]   ;;  %v1305_v35 = vld [vmem:[%s1861_s5 + $0x50] sm:$0xff]  }
   0xf   :  { %v1300_v30 = vld [vmem:[%s1861_s5 + $0x80] sm:$0xff]   ;;  %v1303_v33 = vld [vmem:[%s1861_s5 + $0x8] sm:$0xff]  }
  0x10   :  { %v1304_v34 = vld [vmem:[%s1861_s5 + $0x88] sm:$0xff]  }
  0x11   :  { %331 = vmatpush1.bf16.msra.mxu0 %v1271_v36  ;;  %384 = vmatpush1.bf16.msra.mxu1 %v1272_v37  ;;  %v1306_v36 = vld [vmem:[%s1861_s5 + $0xd0] sm:$0xff]  }
  0x12   :  { %332 = vmatprep.subr.bf16.mxu0 %v1273_v38  ;;  %385 = vmatprep.subr.bf16.mxu1 %v1275_v39  ;;  %v1307_v37 = vld [vmem:[%s1861_s5 + $0x10] sm:$0xff]   ;;  %v1309_v39 = vld [vmem:[%s1861_s5 + $0x58] sm:$0xff]  }
  0x13   :  { %v1308_v38 = vld [vmem:[%s1861_s5 + $0x90] sm:$0xff]  }
  0x15   :  { %333 = vmatpush1.bf16.msra.mxu0 %v1277_v40  ;;  %386 = vmatpush1.bf16.msra.mxu1 %v1278_v41  ;;  %v1310_v40 = vld [vmem:[%s1861_s5 + $0xd8] sm:$0xff]  }
  0x16   :  { %334 = vmatprep.subr.bf16.mxu0 %v1279_v42  ;;  %387 = vmatprep.subr.bf16.mxu1 %v1281_v43  ;;  %v1311_v41 = vld [vmem:[%s1861_s5 + $0x18] sm:$0xff]   ;;  %v1313_v43 = vld [vmem:[%s1861_s5 + $0x60] sm:$0xff]  }
  0x17   :  { %v1312_v42 = vld [vmem:[%s1861_s5 + $0x98] sm:$0xff]  }
  0x19   :  { %335 = vmatpush1.bf16.msra.mxu0 %v1283_v44  ;;  %388 = vmatpush1.bf16.msra.mxu1 %v1284_v45  ;;  %v1314_v44 = vld [vmem:[%s1861_s5 + $0xe0] sm:$0xff]  }
  0x1a   :  { %336 = vmatprep.subr.bf16.mxu0 %v1285_v46  ;;  %389 = vmatprep.subr.bf16.mxu1 %v1287_v47  ;;  %v1315_v45 = vld [vmem:[%s1861_s5 + $0x20] sm:$0xff]   ;;  %v1317_v47 = vld [vmem:[%s1861_s5 + $0x68] sm:$0xff]  }
  0x1b   :  { %v1316_v46 = vld [vmem:[%s1861_s5 + $0xa0] sm:$0xff]  }
  0x1d   :  { %337 = vmatpush1.bf16.msra.mxu0 %v1289_v48  ;;  %390 = vmatpush1.bf16.msra.mxu1 %v1290_v49  ;;  %v1318_v48 = vld [vmem:[%s1861_s5 + $0xe8] sm:$0xff]  }
  0x1e   :  { %338 = vmatprep.subr.bf16.mxu0 %v1291_v50  ;;  %391 = vmatprep.subr.bf16.mxu1 %v1293_v51  ;;  %v1319_v49 = vld [vmem:[%s1861_s5 + $0x28] sm:$0xff]   ;;  %v1321_v51 = vld [vmem:[%s1861_s5 + $0x70] sm:$0xff]  }
  0x1f   :  { %v1320_v50 = vld [vmem:[%s1861_s5 + $0xa8] sm:$0xff]  }
  0x21   :  { %339 = vmatpush1.bf16.msra.mxu0 %v1295_v53  ;;  %392 = vmatpush1.bf16.msra.mxu1 %v1296_v54  ;;  %v1323_v53 = vld [vmem:[%s1861_s5 + $0x30] sm:$0xff]  }
  0x22   :  { %1162 = vmatprep.subr.bf16.mxu0 %v1297_v29  ;;  %v1324_v54 = vld [vmem:[%s1861_s5 + $0xb0] sm:$0xff]  }
  0x91   :  { %v42_v12 = vpop.xlane.xlu0 %41  ;;  %v46_v13 = vpop.xlane.xlu1 %45 }
  0x92   :  { %v50_v14 = vmul.f32 0.0078125, %v42_v12  ;;  %v52_v15 = vmul.f32 0.0078125, %v46_v13 }
  0x94   :  { %v1465_v16 = vsub.f32 %v1434_v2, %v50_v14  ;;  %v1468_v17 = vsub.f32 %v1436_v3, %v52_v15  ;;  %v1078_v14 = vld [vmem:[%s1860_s2] ss:$0 sm:$0xff] }
  0x95   :  { %v44_v18 = vpop.xlane.xlu0 %43  ;;  %v48_v19 = vpop.xlane.xlu1 %47 }
  0x96   :  { %v51_v20 = vmul.f32 0.0078125, %v44_v18  ;;  %v58_v21 = vmul.f32 %v1465_v16, %v1465_v16  ;;  %v53_v22 = vmul.f32 0.0078125, %v48_v19  ;;  %v60_v25 = vmul.f32 %v1468_v17, %v1468_v17 }
  0x98   :  { %v1473_v23 = vsub.f32 %v1440_v4, %v51_v20  ;;  %62 = vadd.xlane.f32.xlu0 %v58_v21  ;;  %v1476_v24 = vsub.f32 %v1442_v5, %v53_v22 }
  0x9a   :  { %v59_v26 = vmul.f32 %v1473_v23, %v1473_v23  ;;  %v61_v27 = vmul.f32 %v1476_v24, %v1476_v24 }
  0x9c   :  { %66 = vadd.xlane.f32.xlu0 %v60_v25  ;;  %64 = vadd.xlane.f32.xlu1 %v59_v26 }
  0xa0   :  { %68 = vadd.xlane.f32.xlu1 %v61_v27 }
 0x125   :  { %v63_v55 = vpop.xlane.xlu0 %62 }
 0x126   :  { %v70_v56 = vmul.f32 0.0078125, %v63_v55  ;;  %v1325_v55 = vld [vmem:[%s1861_s5 + $0x78] sm:$0xff]  }
 0x128   :  { %v74_v57 = vadd.f32 1e-05, %v70_v56  ;;  %v1326_v56 = vld [vmem:[%s1861_s5 + $0xf8] sm:$0xff]  }
 0x129   :  { %v65_v58 = vpop.xlane.xlu1 %64  ;;  %v67_v59 = vpop.xlane.xlu0 %66 }
 0x12a   :  { %1337 = vrsqrt.f32 %v74_v57  ;;  %v71_v60 = vmul.f32 0.0078125, %v65_v58  ;;  %v72_v61 = vmul.f32 0.0078125, %v67_v59  ;;  %v1327_v57 = vld [vmem:[%s1861_s5 + $0x38] sm:$0xff]   ;;  %v1671_v59 = vld [vmem:[%s1862_s7] sm:$0xff]  }
 0x12b   :  { %v1328_v58 = vld [vmem:[%s1861_s5 + $0xb8] sm:$0xff]  }
 0x12c   :  { %v75_v62 = vadd.f32 1e-05, %v71_v60  ;;  %v76_v63 = vadd.f32 1e-05, %v72_v61  ;;  %v144_v60 = vlaneseq }
 0x12d   :  { %v69_v0 = vpop.xlane.xlu1 %68 }
 0x12e   :  { %1339 = vrsqrt.f32 %v75_v62  ;;  %v73_v1 = vmul.f32 0.0078125, %v69_v0  ;;  %v145_v61 = vshrl.u32 %v144_v60, 7  ;;  %v142_v0 = vld [vmem:[%s1863_s4] sm:$0xf] }
 0x12f   :  { %1341 = vrsqrt.f32 %v76_v63 }
 0x130   :  { %v77_v6 = vadd.f32 1e-05, %v73_v1  ;;  %v146_v62 = vsub.s32 0, %v145_v61  ;;  %v154_v63 = vsub.s32 2, %v145_v61  ;;  %v150_v1 = vsub.s32 1, %v145_v61 }
 0x132   :  { %1343 = vrsqrt.f32 %v77_v6  ;;  %v158_v6 = vsub.s32 3, %v145_v61 }
 0x134   :  { %v1338_v7 = vpop.eup %1337 }
 0x135   :  { %v82_v8 = vmul.f32 %v1338_v7, %v1465_v16  ;;  %v1677_v7 = vrot.slane %v142_v0, %v146_v62 }
 0x137   :  { %v93_v12 = vmul.f32 %v1077_v9, %v82_v8  ;;  %v1679_v8 = vrot.slane %v142_v0, %v154_v63 }
 0x138   :  { %v1340_v10 = vpop.eup %1339 }
 0x139   :  { %v83_v11 = vmul.f32 %v1340_v10, %v1473_v23  ;;  %v1342_v13 = vpop.eup %1341  ;;  %v104_v19 = vadd.f32 %v1078_v14, %v93_v12  ;;  %v1683_v10 = vrot.slane %v142_v0, %v158_v6 }
 0x13a   :  { %v84_v21 = vmul.f32 %v1342_v13, %v1468_v17  ;;  %v1298_v17 = vld [vmem:[%s1861_s5 + $0xc0] sm:$0xff]  }
 0x13b   :  { %v94_v15 = vmul.f32 %v1077_v9, %v83_v11  ;;  %1190 = vmatprep.subr.bf16.mxu1 %v1298_v17 }
 0x13c   :  { %v1344_v18 = vpop.eup %1343  ;;  %v95_v26 = vmul.f32 %v1077_v9, %v84_v21 }
 0x13d   :  { %v105_v20 = vadd.f32 %v1078_v14, %v94_v15  ;;  %v85_v16 = vmul.f32 %v1344_v18, %v1476_v24  ;;  %v1299_v24 = vld [vmem:[%s1861_s5] sm:$0xff]  }
 0x13e   :  { %v106_v27 = vadd.f32 %v1078_v14, %v95_v26 }
 0x13f   :  { %v108_v22 = vpack.c.bf16 %v105_v20, %v104_v19  ;;  %v96_v25 = vmul.f32 %v1077_v9, %v85_v16  ;;  %v1681_v9 = vrot.slane %v142_v0, %v150_v1 }
 0x141   :  { %357 = vmatmul.mubr.bf16.vlgmr.msra.gmra.mrb[0].mxu0 %v108_v22  ;;  %410 = vmatmul.mubr.bf16.vlgmr.msra.gmra.mrb[0].mxu1 %v108_v22  ;;  %v107_v23 = vadd.f32 %v1078_v14, %v96_v25 }
 0x142   :  { %366 = vmatprep.mubr.bf16.mxu0 %v1377_v52  ;;  %419 = vmatprep.mubr.bf16.mxu1 %v1377_v52  ;;  %v1322_v52 = vld [vmem:[%s1861_s5 + $0xf0] sm:$0xff]  }
 0x143   :  { %v109_v28 = vpack.c.bf16 %v107_v23, %v106_v27  ;;  %1163 = vmatpush3.bf16.msra.mxu0 %v1299_v24  ;;  %1191 = vmatpush3.bf16.msra.mxu1 %v1300_v30 }
 0x144   :  { %1164 = vmatprep.subr.bf16.mxu0 %v1301_v31  ;;  %1192 = vmatprep.subr.bf16.mxu1 %v1302_v32 }
 0x147   :  { %1165 = vmatpush3.bf16.msra.mxu0 %v1303_v33  ;;  %1193 = vmatpush3.bf16.msra.mxu1 %v1304_v34 }
 0x148   :  { %1166 = vmatprep.subr.bf16.mxu0 %v1305_v35  ;;  %1194 = vmatprep.subr.bf16.mxu1 %v1306_v36 }
 0x149   :  { %367 = vmatmul.mubr.bf16.gmra.mrb[4].mxu0 %v109_v28  ;;  %420 = vmatmul.mubr.bf16.gmra.mrb[4].mxu1 %v109_v28 }
 0x14b   :  { %1167 = vmatpush3.bf16.msra.mxu0 %v1307_v37  ;;  %1195 = vmatpush3.bf16.msra.mxu1 %v1308_v38 }
 0x14c   :  { %1168 = vmatprep.subr.bf16.mxu0 %v1309_v39  ;;  %1196 = vmatprep.subr.bf16.mxu1 %v1310_v40 }
 0x14f   :  { %1169 = vmatpush3.bf16.msra.mxu0 %v1311_v41  ;;  %1197 = vmatpush3.bf16.msra.mxu1 %v1312_v42 }
 0x150   :  { %1170 = vmatprep.subr.bf16.mxu0 %v1313_v43  ;;  %1198 = vmatprep.subr.bf16.mxu1 %v1314_v44 }
 0x153   :  { %1171 = vmatpush3.bf16.msra.mxu0 %v1315_v45  ;;  %1199 = vmatpush3.bf16.msra.mxu1 %v1316_v46 }
 0x154   :  { %1172 = vmatprep.subr.bf16.mxu0 %v1317_v47  ;;  %1200 = vmatprep.subr.bf16.mxu1 %v1318_v48 }
 0x157   :  { %1173 = vmatpush3.bf16.msra.mxu0 %v1319_v49  ;;  %1201 = vmatpush3.bf16.msra.mxu1 %v1320_v50 }
 0x158   :  { %1174 = vmatprep.subr.bf16.mxu0 %v1321_v51  ;;  %1202 = vmatprep.subr.bf16.mxu1 %v1322_v52 }
 0x15b   :  { %1175 = vmatpush3.bf16.msra.mxu0 %v1323_v53  ;;  %1203 = vmatpush3.bf16.msra.mxu1 %v1324_v54 }
 0x15c   :  { %1176 = vmatprep.subr.bf16.mxu0 %v1325_v55  ;;  %1204 = vmatprep.subr.bf16.mxu1 %v1326_v56 }
 0x15f   :  { %1177 = vmatpush3.bf16.msra.mxu0 %v1327_v57  ;;  %1205 = vmatpush3.bf16.msra.mxu1 %v1328_v58 }
 0x160   :  { %1228 = vmatprep.subr.bf16.mxu0 %v1671_v59 }
 0x214   :  { %v358_v11 = vpop.f32.mrb[0].mxu0  ;;  %v411_v12 = vpop.f32.mrb[0].mxu1 }
 0x215   :  { %v1686_v13 = vadd.f32 %v358_v11, %v1677_v7  ;;  %v1689_v14 = vadd.f32 %v411_v12, %v1679_v8  ;;  %v360_v15 = vpop.f32.mrb[1].mxu0  ;;  %v413_v18 = vpop.f32.mrb[1].mxu1 }
 0x216   :  { %v1692_v19 = vadd.f32 %v360_v15, %v1681_v9  ;;  %v1695_v20 = vadd.f32 %v413_v18, %v1683_v10  ;;  %v362_v21 = vpop.f32.mrb[2].mxu0  ;;  %v415_v16 = vpop.f32.mrb[2].mxu1 }
 0x217   :  { %v430_v22 = vmul.f32 %v1686_v13, %v1686_v13  ;;  %v432_v25 = vmul.f32 %v1689_v14, %v1689_v14  ;;  %v1702_v26 = vadd.f32 %v362_v21, %v1677_v7  ;;  %v1705_v23 = vadd.f32 %v415_v16, %v1679_v8  ;;  %v364_v27 = vpop.f32.mrb[3].mxu0  ;;  %v417_v28 = vpop.f32.mrb[3].mxu1 }
 0x218   :  { %v431_v29 = vmul.f32 %v1692_v19, %v1692_v19  ;;  %v433_v17 = vmul.f32 %v1695_v20, %v1695_v20  ;;  %v1712_v24 = vadd.f32 %v364_v27, %v1681_v9  ;;  %v1715_v30 = vadd.f32 %v417_v28, %v1683_v10 }
 0x219   :  { %v446_v31 = vmul.f32 %v430_v22, %v1686_v13  ;;  %v448_v32 = vmul.f32 %v432_v25, %v1689_v14  ;;  %v434_v33 = vmul.f32 %v1702_v26, %v1702_v26  ;;  %v436_v34 = vmul.f32 %v1705_v23, %v1705_v23 }
 0x21a   :  { %v447_v35 = vmul.f32 %v431_v29, %v1692_v19  ;;  %v449_v36 = vmul.f32 %v433_v17, %v1695_v20  ;;  %v435_v37 = vmul.f32 %v1712_v24, %v1712_v24  ;;  %v437_v38 = vmul.f32 %v1715_v30, %v1715_v30 }
 0x21b   :  { %v462_v39 = vmul.f32 0.044715, %v446_v31  ;;  %v464_v40 = vmul.f32 0.044715, %v448_v32  ;;  %v450_v41 = vmul.f32 %v434_v33, %v1702_v26  ;;  %v452_v42 = vmul.f32 %v436_v34, %v1705_v23 }
 0x21c   :  { %v463_v43 = vmul.f32 0.044715, %v447_v35  ;;  %v465_v44 = vmul.f32 0.044715, %v449_v36  ;;  %v451_v45 = vmul.f32 %v435_v37, %v1712_v24  ;;  %v453_v46 = vmul.f32 %v437_v38, %v1715_v30  ;;  %v368_v47 = vpop.f32.mrb[4].mxu0  ;;  %v421_v48 = vpop.f32.mrb[4].mxu1 }
 0x21d   :  { %v478_v49 = vadd.f32 %v462_v39, %v1686_v13  ;;  %v480_v50 = vadd.f32 %v464_v40, %v1689_v14  ;;  %v466_v51 = vmul.f32 0.044715, %v450_v41  ;;  %v468_v52 = vmul.f32 0.044715, %v452_v42  ;;  %v370_v53 = vpop.f32.mrb[5].mxu0  ;;  %v423_v54 = vpop.f32.mrb[5].mxu1 }
 0x21e   :  { %v479_v55 = vadd.f32 %v463_v43, %v1692_v19  ;;  %v481_v56 = vadd.f32 %v465_v44, %v1695_v20  ;;  %v467_v57 = vmul.f32 0.044715, %v451_v45  ;;  %v469_v58 = vmul.f32 0.044715, %v453_v46  ;;  %v372_v60 = vpop.f32.mrb[6].mxu0  ;;  %v425_v61 = vpop.f32.mrb[6].mxu1 }
 0x21f   :  { %v494_v62 = vmul.f32 0.7978846, %v478_v49  ;;  %v496_v63 = vmul.f32 0.7978846, %v480_v50  ;;  %v482_v0 = vadd.f32 %v466_v51, %v1702_v26  ;;  %v484_v1 = vadd.f32 %v468_v52, %v1705_v23  ;;  %v374_v6 = vpop.f32.mrb[7].mxu0  ;;  %v427_v11 = vpop.f32.mrb[7].mxu1 }
 0x220   :  { %v495_v12 = vmul.f32 0.7978846, %v479_v55  ;;  %v497_v15 = vmul.f32 0.7978846, %v481_v56  ;;  %v483_v18 = vadd.f32 %v467_v57, %v1712_v24  ;;  %v485_v21 = vadd.f32 %v469_v58, %v1715_v30 }
 0x221   :  { %1345 = vtanh.f32 %v494_v62  ;;  %v498_v16 = vmul.f32 0.7978846, %v482_v0  ;;  %v500_v22 = vmul.f32 0.7978846, %v484_v1  ;;  %v1742_v25 = vadd.f32 %v368_v47, %v1677_v7 }
 0x222   :  { %1347 = vtanh.f32 %v496_v63  ;;  %v499_v27 = vmul.f32 0.7978846, %v483_v18  ;;  %v501_v28 = vmul.f32 0.7978846, %v485_v21  ;;  %v1745_v29 = vadd.f32 %v421_v48, %v1679_v8 }
 0x223   :  { %1349 = vtanh.f32 %v495_v12  ;;  %v438_v17 = vmul.f32 %v1742_v25, %v1742_v25  ;;  %v1750_v31 = vadd.f32 %v370_v53, %v1681_v9  ;;  %v1753_v32 = vadd.f32 %v423_v54, %v1683_v10 }
 0x224   :  { %1351 = vtanh.f32 %v497_v15  ;;  %v440_v33 = vmul.f32 %v1745_v29, %v1745_v29  ;;  %v1758_v34 = vadd.f32 %v372_v60, %v1677_v7  ;;  %v1761_v35 = vadd.f32 %v425_v61, %v1679_v8 }
 0x225   :  { %1353 = vtanh.f32 %v498_v16  ;;  %v454_v36 = vmul.f32 %v438_v17, %v1742_v25  ;;  %v439_v37 = vmul.f32 %v1750_v31, %v1750_v31  ;;  %v441_v38 = vmul.f32 %v1753_v32, %v1753_v32 }
 0x226   :  { %1355 = vtanh.f32 %v500_v22  ;;  %v456_v39 = vmul.f32 %v440_v33, %v1745_v29  ;;  %v442_v40 = vmul.f32 %v1758_v34, %v1758_v34  ;;  %v444_v7 = vmul.f32 %v1761_v35, %v1761_v35 }
 0x227   :  { %1357 = vtanh.f32 %v499_v27  ;;  %v470_v8 = vmul.f32 0.044715, %v454_v36  ;;  %v455_v41 = vmul.f32 %v439_v37, %v1750_v31  ;;  %v457_v42 = vmul.f32 %v441_v38, %v1753_v32 }
 0x228   :  { %1359 = vtanh.f32 %v501_v28  ;;  %v472_v43 = vmul.f32 0.044715, %v456_v39  ;;  %v458_v44 = vmul.f32 %v442_v40, %v1758_v34  ;;  %v460_v45 = vmul.f32 %v444_v7, %v1761_v35 }
 0x229   :  { %v486_v46 = vadd.f32 %v470_v8, %v1742_v25  ;;  %v471_v47 = vmul.f32 0.044715, %v455_v41  ;;  %v473_v48 = vmul.f32 0.044715, %v457_v42  ;;  %v1779_v49 = vadd.f32 %v374_v6, %v1681_v9 }
 0x22a   :  { %v488_v50 = vadd.f32 %v472_v43, %v1745_v29  ;;  %v474_v51 = vmul.f32 0.044715, %v458_v44  ;;  %v476_v52 = vmul.f32 0.044715, %v460_v45  ;;  %v1783_v53 = vadd.f32 %v427_v11, %v1683_v10 }
 0x22b   :  { %v1346_v54 = vpop.eup %1345  ;;  %v502_v55 = vmul.f32 0.7978846, %v486_v46  ;;  %v487_v56 = vadd.f32 %v471_v47, %v1750_v31  ;;  %v489_v57 = vadd.f32 %v473_v48, %v1753_v32  ;;  %v443_v58 = vmul.f32 %v1779_v49, %v1779_v49 }
 0x22c   :  { %v1348_v60 = vpop.eup %1347  ;;  %v526_v61 = vadd.f32 1.0, %v1346_v54  ;;  %v504_v9 = vmul.f32 0.7978846, %v488_v50  ;;  %v490_v62 = vadd.f32 %v474_v51, %v1758_v34  ;;  %v492_v63 = vadd.f32 %v476_v52, %v1761_v35 }
 0x22d   :  { %v1350_v0 = vpop.eup %1349  ;;  %v528_v1 = vadd.f32 1.0, %v1348_v60  ;;  %1361 = vtanh.f32 %v502_v55  ;;  %v503_v10 = vmul.f32 0.7978846, %v487_v56  ;;  %v505_v6 = vmul.f32 0.7978846, %v489_v57 }
 0x22e   :  { %v1352_v11 = vpop.eup %1351  ;;  %v542_v12 = vmul.f32 0.5, %v526_v61  ;;  %1363 = vtanh.f32 %v504_v9  ;;  %v506_v15 = vmul.f32 0.7978846, %v490_v62  ;;  %v508_v18 = vmul.f32 0.7978846, %v492_v63 }
 0x22f   :  { %v1354_v21 = vpop.eup %1353  ;;  %v544_v16 = vmul.f32 0.5, %v528_v1  ;;  %1365 = vtanh.f32 %v503_v10  ;;  %v459_v22 = vmul.f32 %v443_v58, %v1779_v49  ;;  %v445_v27 = vmul.f32 %v1783_v53, %v1783_v53  ;;  %v1330_v10 = vld [vmem:[%s1862_s7 + $0x8] sm:$0xff]  }
 0x230   :  { %v1356_v28 = vpop.eup %1355  ;;  %v558_v17 = vmul.f32 %v542_v12, %v1686_v13  ;;  %v530_v33 = vadd.f32 1.0, %v1354_v21  ;;  %1367 = vtanh.f32 %v505_v6  ;;  %v527_v36 = vadd.f32 1.0, %v1350_v0  ;;  %v1331_v21 = vld [vmem:[%s1862_s7 + $0x10] sm:$0xff]  }
 0x231   :  { %v1358_v37 = vpop.eup %1357  ;;  %v560_v38 = vmul.f32 %v544_v16, %v1689_v14  ;;  %v532_v39 = vadd.f32 1.0, %v1356_v28  ;;  %1369 = vtanh.f32 %v506_v15  ;;  %v475_v40 = vmul.f32 0.044715, %v459_v22 }
 0x232   :  { %v1360_v7 = vpop.eup %1359  ;;  %v546_v8 = vmul.f32 0.5, %v530_v33  ;;  %1371 = vtanh.f32 %v508_v18  ;;  %v461_v41 = vmul.f32 %v445_v27, %v1783_v53  ;;  %v531_v42 = vadd.f32 1.0, %v1358_v37 }
 0x233   :  { %v548_v43 = vmul.f32 0.5, %v532_v39  ;;  %v491_v44 = vadd.f32 %v475_v40, %v1779_v49  ;;  %v543_v45 = vmul.f32 0.5, %v527_v36  ;;  %v529_v13 = vadd.f32 1.0, %v1352_v11 }
 0x234   :  { %v562_v46 = vmul.f32 %v546_v8, %v1702_v26  ;;  %v477_v47 = vmul.f32 0.044715, %v461_v41  ;;  %v547_v48 = vmul.f32 0.5, %v531_v42  ;;  %v533_v50 = vadd.f32 1.0, %v1360_v7 }
 0x235   :  { %v564_v14 = vmul.f32 %v548_v43, %v1705_v23  ;;  %v507_v51 = vmul.f32 0.7978846, %v491_v44  ;;  %v559_v52 = vmul.f32 %v543_v45, %v1692_v19  ;;  %v545_v54 = vmul.f32 0.5, %v529_v13 }
 0x236   :  { %v574_v55 = vpack.c.bf16 %v562_v46, %v558_v17  ;;  %v493_v56 = vadd.f32 %v477_v47, %v1783_v53  ;;  %v563_v57 = vmul.f32 %v547_v48, %v1712_v24  ;;  %v549_v58 = vmul.f32 0.5, %v533_v50  ;;  %v1332_v46 = vld [vmem:[%s1862_s7 + $0x18] sm:$0xff]   ;;  %v1111_v48 = vld [vmem:[%s1864_s6] ss:$0 sm:$0xff] }
 0x237   :  { %v1362_v60 = vpop.eup %1361  ;;  %v576_v61 = vpack.c.bf16 %v564_v14, %v560_v38  ;;  %1373 = vtanh.f32 %v507_v51  ;;  %v561_v26 = vmul.f32 %v545_v54, %v1695_v20 }
 0x238   :  { %v1364_v9 = vpop.eup %1363  ;;  %v509_v62 = vmul.f32 0.7978846, %v493_v56  ;;  %v575_v63 = vpack.c.bf16 %v563_v57, %v559_v52  ;;  %v565_v23 = vmul.f32 %v549_v58, %v1715_v30  ;;  %v534_v0 = vadd.f32 1.0, %v1362_v60 }
 0x239   :  { %v1366_v1 = vpop.eup %1365  ;;  %v536_v19 = vadd.f32 1.0, %v1364_v9 }
 0x23a   :  { %v1368_v6 = vpop.eup %1367  ;;  %1375 = vtanh.f32 %v509_v62  ;;  %877 = vmatprep.mubr.bf16.mxu0 %v575_v63  ;;  %v577_v24 = vpack.c.bf16 %v565_v23, %v561_v26  ;;  %v550_v15 = vmul.f32 0.5, %v534_v0  ;;  %v535_v16 = vadd.f32 1.0, %v1366_v1 }
 0x23b   :  { %v1370_v11 = vpop.eup %1369  ;;  %878 = vmatmul.mubr.bf16.vlgmr.msra.gmra.mrb[8].mxu0 %v574_v55  ;;  %v552_v18 = vmul.f32 0.5, %v536_v19  ;;  %v537_v36 = vadd.f32 1.0, %v1368_v6 }
 0x23c   :  { %v1372_v12 = vpop.eup %1371  ;;  %926 = vmatprep.mubr.bf16.mxu1 %v577_v24  ;;  %v538_v20 = vadd.f32 1.0, %v1370_v11  ;;  %1229 = vmatpush3.bf16.msra.mxu0 %v1671_v59  ;;  %v566_v28 = vmul.f32 %v550_v15, %v1742_v25  ;;  %v551_v39 = vmul.f32 0.5, %v535_v16 }
 0x23d   :  { %927 = vmatmul.mubr.bf16.vlgmr.msra.gmra.mrb[8].mxu1 %v576_v61  ;;  %v540_v30 = vadd.f32 1.0, %v1372_v12  ;;  %1230 = vmatprep.subr.bf16.mxu0 %v1330_v10  ;;  %v568_v59 = vmul.f32 %v552_v18, %v1745_v29  ;;  %v553_v43 = vmul.f32 0.5, %v537_v36  ;;  %v1144_v36 = vld [vmem:[%s1865_s8] ss:$0 sm:$0xff] }
 0x23e   :  { %v554_v22 = vmul.f32 0.5, %v538_v20  ;;  %v567_v25 = vmul.f32 %v551_v39, %v1750_v31  ;;  %v1333_v31 = vld [vmem:[%s1862_s7 + $0x20] sm:$0xff]  }
 0x23f   :  { %v556_v27 = vmul.f32 0.5, %v540_v30  ;;  %v569_v29 = vmul.f32 %v553_v43, %v1753_v32  ;;  %v1334_v32 = vld [vmem:[%s1862_s7 + $0x28] sm:$0xff]  }
 0x240   :  { %v570_v17 = vmul.f32 %v554_v22, %v1758_v34  ;;  %1231 = vmatpush3.bf16.msra.mxu0 %v1330_v10 }
 0x241   :  { %v1374_v33 = vpop.eup %1373  ;;  %v572_v37 = vmul.f32 %v556_v27, %v1761_v35  ;;  %1232 = vmatprep.subr.bf16.mxu0 %v1331_v21 }
 0x242   :  { %v539_v38 = vadd.f32 1.0, %v1374_v33  ;;  %v578_v40 = vpack.c.bf16 %v570_v17, %v566_v28 }
 0x243   :  { %v580_v7 = vpack.c.bf16 %v572_v37, %v568_v59 }
 0x244   :  { %v1376_v8 = vpop.eup %1375  ;;  %v555_v41 = vmul.f32 0.5, %v539_v38  ;;  %1233 = vmatpush3.bf16.msra.mxu0 %v1331_v21 }
 0x245   :  { %v541_v42 = vadd.f32 1.0, %v1376_v8  ;;  %1234 = vmatprep.subr.bf16.mxu0 %v1332_v46 }
 0x246   :  { %v571_v34 = vmul.f32 %v555_v41, %v1779_v49  ;;  %v1335_v49 = vld [vmem:[%s1862_s7 + $0x30] sm:$0xff]  }
 0x247   :  { %v557_v44 = vmul.f32 0.5, %v541_v42 }
 0x248   :  { %v579_v45 = vpack.c.bf16 %v571_v34, %v567_v25  ;;  %1235 = vmatpush3.bf16.msra.mxu0 %v1332_v46 }
 0x249   :  { %v573_v35 = vmul.f32 %v557_v44, %v1783_v53  ;;  %1236 = vmatprep.subr.bf16.mxu0 %v1333_v31  ;;  %v1336_v53 = vld [vmem:[%s1862_s7 + $0x38] sm:$0xff]  }
 0x24a   :  { %885 = vmatprep.mubr.bf16.mxu0 %v579_v45 }
 0x24b   :  { %v581_v13 = vpack.c.bf16 %v573_v35, %v569_v29  ;;  %886 = vmatmul.mubr.bf16.gmra.mrb[12].mxu0 %v578_v40 }
 0x24c   :  { %1237 = vmatpush3.bf16.msra.mxu0 %v1333_v31 }
 0x24d   :  { %934 = vmatprep.mubr.bf16.mxu1 %v581_v13  ;;  %1238 = vmatprep.subr.bf16.mxu0 %v1334_v32 }
 0x24e   :  { %935 = vmatmul.mubr.bf16.gmra.mrb[12].mxu1 %v580_v7 }
 0x250   :  { %1239 = vmatpush3.bf16.msra.mxu0 %v1334_v32 }
 0x251   :  { %1240 = vmatprep.subr.bf16.mxu0 %v1335_v49 }
 0x254   :  { %1241 = vmatpush3.bf16.msra.mxu0 %v1335_v49 }
 0x255   :  { %1242 = vmatprep.subr.bf16.mxu0 %v1336_v53 }
 0x258   :  { %1243 = vmatpush3.bf16.msra.mxu0 %v1336_v53 }
 0x30e   :  { %v1178_v47 = vpop.f32.mrb[8].mxu0 }
 0x30f   :  { %v1179_v50 = vpop.f32.mrb[9].mxu0 }
 0x310   :  { %v1206_v14 = vpop.f32.mrb[8].mxu1  ;;  %v1180_v51 = vadd.f32 %v1179_v50, %v1178_v47  ;;  %v1181_v52 = vpop.f32.mrb[10].mxu0 }
 0x311   :  { %v1207_v54 = vpop.f32.mrb[9].mxu1  ;;  %v1182_v55 = vpop.f32.mrb[11].mxu0 }
 0x312   :  { %v880_v56 = vadd.f32 %v1180_v51, %v1111_v48  ;;  %v1208_v57 = vadd.f32 %v1207_v54, %v1206_v14  ;;  %v1209_v58 = vpop.f32.mrb[10].mxu1  ;;  %v1183_v60 = vadd.f32 %v1182_v55, %v1181_v52 }
 0x313   :  { %v1210_v61 = vpop.f32.mrb[11].mxu1 }
 0x314   :  { %v929_v26 = vadd.f32 %v1208_v57, %v880_v56  ;;  %v883_v9 = vadd.f32 %v1183_v60, %v1111_v48  ;;  %v1211_v62 = vadd.f32 %v1210_v61, %v1209_v58 }
 0x316   :  { %v932_v63 = vadd.f32 %v1211_v62, %v883_v9  ;;  %v943_v23 = vadd.f32 %v1434_v2, %v929_v26 }
 0x318   :  { %v944_v0 = vadd.f32 %v1440_v4, %v932_v63 }
 0x31a   :  { %v947_v1 = vpack.c.bf16 %v944_v0, %v943_v23 }
 0x31c   :  { %1244 = vmatprep.mubr.bf16.mxu0 %v947_v1 }
 0x31e   :  { %v1184_v19 = vpop.f32.mrb[12].mxu0 }
 0x31f   :  { %v1185_v10 = vpop.f32.mrb[13].mxu0 }
 0x320   :  { %v1186_v6 = vadd.f32 %v1185_v10, %v1184_v19  ;;  %v1187_v24 = vpop.f32.mrb[14].mxu0 }
 0x321   :  { %v1212_v11 = vpop.f32.mrb[12].mxu1  ;;  %v1188_v12 = vpop.f32.mrb[15].mxu0 }
 0x322   :  { %v888_v20 = vadd.f32 %v1186_v6, %v1111_v48  ;;  %v1213_v15 = vpop.f32.mrb[13].mxu1  ;;  %v1189_v30 = vadd.f32 %v1188_v12, %v1187_v24 }
 0x323   :  { %v1214_v18 = vadd.f32 %v1213_v15, %v1212_v11  ;;  %v1215_v21 = vpop.f32.mrb[14].mxu1 }
 0x324   :  { %v891_v16 = vadd.f32 %v1189_v30, %v1111_v48  ;;  %v1216_v22 = vpop.f32.mrb[15].mxu1 }
 0x325   :  { %v937_v27 = vadd.f32 %v1214_v18, %v888_v20  ;;  %v1217_v28 = vadd.f32 %v1216_v22, %v1215_v21 }
 0x327   :  { %v940_v2 = vadd.f32 %v1217_v28, %v891_v16  ;;  %v945_v4 = vadd.f32 %v1436_v3, %v937_v27 }
 0x329   :  { %v946_v17 = vadd.f32 %v1442_v5, %v940_v2 }
 0x32b   :  { %v948_v33 = vpack.c.bf16 %v946_v17, %v945_v4 }
 0x32d   :  { %1245 = vmatmul.mubr.bf16.vlgmr.msra.gmra.mrb[16].mxu0 %v948_v33 }
 0x400   :  { %v1246_v59 = vpop.f32.mrb[16].mxu0 }
 0x401   :  { %v1063_v37 = vadd.f32 %v1246_v59, %v1144_v36  ;;  %v1054_v38 = vpop.f32.mrb[17].mxu0 }
 0x402   :  { %v1055_v39 = vadd.f32 %v1144_v36, %v1054_v38  ;;  %v1247_v40 = vpop.f32.mrb[18].mxu0 }
 0x403   :  { %1071 = vst [vmem:[%s1866_s9 + $0x10] sm:$0xff] %v1063_v37  ;;  %v1066_v7 = vadd.f32 %v1247_v40, %v1144_v36  ;;  %v1057_v8 = vpop.f32.mrb[19].mxu0 }
 0x404   :  { %1069 = vst [vmem:[%s1866_s9] sm:$0xff] %v1055_v39  ;;  %v1058_v3 = vadd.f32 %v1144_v36, %v1057_v8 }
 0x405   :  { %1072 = vst [vmem:[%s1866_s9 + $0x18] sm:$0xff] %v1066_v7 }
 0x406   :  { %1070 = vst [vmem:[%s1866_s9 + $0x8] sm:$0xff] %v1058_v3 }

</bundles_post_ra>
